<compile_context>
chip_gen: v5e
topology: v5e:2x2
jax: 0.10.0
libtpu: 0.0.40
codegen_flags: <defaults>
</compile_context>

<pallas_src>
import functools

import jax
import jax.numpy as jnp
from jax.experimental import pallas as pl
from jax.experimental.pallas import tpu as pltpu

NEG_SLOPE = 0.01   # F.leaky_relu default
EPS = 1e-5         # nn.GroupNorm default


# ---------------------------------------------------------------------------
# Kernel 1: fused conv3x3x3 (packed K = 27*C) + leaky_relu + GroupNorm + add
# ---------------------------------------------------------------------------
def _residual_inner_kernel(patches_ref, add_ref, w_ref, gamma_ref, beta_ref,
                           a_ref, o_ref, *, groups):
    # patches: (1, 27*C, S) bf16   add: (1, C, S) f32
    # w: (C, 27*C) bf16            gamma/beta: (C, 1)   a: (C, C)   o: (1, C, S)
    C, S = add_ref.shape[1], add_ref.shape[2]
    cpg = C // groups

    # conv3d 3x3x3 (no bias) as a single packed-K matmul; spatial stays in lanes.
    y = jnp.dot(w_ref[...], patches_ref[0],
                preferred_element_type=jnp.float32)            # (C, S) f32

    # leaky_relu
    y = jnp.where(y > 0, y, NEG_SLOPE * y)

    # GroupNorm(groups, C): per-sample stats over (channels-in-group x spatial).
    s1 = jnp.sum(y, axis=1, keepdims=True)                     # (C, 1)
    s2 = jnp.sum(y * y, axis=1, keepdims=True)                 # (C, 1)
    gs1 = jnp.dot(a_ref[...], s1, preferred_element_type=jnp.float32)
    gs2 = jnp.dot(a_ref[...], s2, preferred_element_type=jnp.float32)
    cnt = float(cpg) * float(S)
    mean = gs1 / cnt
    var = jnp.maximum(gs2 / cnt - mean * mean, 0.0)            # clamp: no NaN rsqrt
    inv = jax.lax.rsqrt(var + EPS)

    o_ref[0] = (y - mean) * inv * gamma_ref[...] + beta_ref[...] + add_ref[0]


def residual_inner(inp, add, w_packed, gamma, beta, a_mat, groups=2):
    """add + GroupNorm(leaky_relu(conv3x3x3(inp))); inp/add are (N, C, D, H, W)."""
    N, C, D, H, W = inp.shape
    S = D * H * W
    K = 27 * C

    # im2col in bf16 with all 27 taps packed into the contraction dimension.
    # TODO(synk): pull the halo/tap extraction inside the kernel (halo BlockSpec
    #             + static ref slices) to remove the 27x HBM blow-up at large D/H/W.
    xp = jnp.pad(inp.astype(jnp.bfloat16),
                 ((0, 0), (0, 0), (1, 1), (1, 1), (1, 1)))
    taps = [xp[:, :, kd:kd + D, kh:kh + H, kw:kw + W].reshape(N, 1, C, S)
            for kd in range(3) for kh in range(3) for kw in range(3)]
    patches = jnp.concatenate(taps, axis=1).reshape(N, K, S)   # (N, 27*C, S)

    out2d = pl.pallas_call(
        functools.partial(_residual_inner_kernel, groups=groups),
        grid=(N,),
        in_specs=[
            pl.BlockSpec((1, K, S), lambda n: (n, 0, 0)),
            pl.BlockSpec((1, C, S), lambda n: (n, 0, 0)),
            pl.BlockSpec((C, K), lambda n: (0, 0)),
            pl.BlockSpec((C, 1), lambda n: (0, 0)),
            pl.BlockSpec((C, 1), lambda n: (0, 0)),
            pl.BlockSpec((C, C), lambda n: (0, 0)),
        ],
        out_specs=pl.BlockSpec((1, C, S), lambda n: (n, 0, 0)),
        out_shape=jax.ShapeDtypeStruct((N, C, S), jnp.float32),
        compiler_params=pltpu.CompilerParams(
            dimension_semantics=("parallel",),
            vmem_limit_bytes=32 * 1024 * 1024),
    )(patches, add.reshape(N, C, S), w_packed.astype(jnp.bfloat16),
      gamma, beta, a_mat)
    return out2d.reshape(N, C, D, H, W)


def reversible_block(x, fparams, gparams, a_mat, groups=2):
    """revtorch ReversibleBlock: y1 = x1 + F(x2); y2 = x2 + G(y1)."""
    half = x.shape[1] // 2
    x1, x2 = x[:, :half], x[:, half:]
    y1 = residual_inner(x2, x1, *fparams, a_mat, groups=groups)
    y2 = residual_inner(y1, x2, *gparams, a_mat, groups=groups)
    return jnp.concatenate([y1, y2], axis=1)


# ---------------------------------------------------------------------------
# Kernel 2: 1x1x1 conv (+bias), spatial in lanes
# ---------------------------------------------------------------------------
def _conv1x1_kernel(x_ref, w_ref, b_ref, o_ref):
    # x: (1, Cin, S) bf16   w: (Cout, Cin) bf16   b: (Cout, 1)   o: (1, Cout, S)
    o_ref[0] = (jnp.dot(w_ref[...], x_ref[0],
                        preferred_element_type=jnp.float32) + b_ref[...])


# ---------------------------------------------------------------------------
# Kernels 3/4: separable trilinear x2 upsample (align_corners=False)
# ---------------------------------------------------------------------------
def _upsample_hw_kernel(x_ref, mh_ref, mwT_ref, o_ref):
    # x: (B, H, W) f32   mh: (2H, H)   mwT: (W, 2W)   o: (B, 2H, 2W)
    t = x_ref[...]
    B = t.shape[0]
    mh_b = jnp.broadcast_to(mh_ref[...], (B,) + tuple(mh_ref.shape))
    th = jnp.einsum('bph,bhw->bpw', mh_b, t,
                    preferred_element_type=jnp.float32)        # (B, 2H, W)
    mw_b = jnp.broadcast_to(mwT_ref[...], (B,) + tuple(mwT_ref.shape))
    o_ref[...] = jnp.einsum('bhw,bwq->bhq', th, mw_b,
                            preferred_element_type=jnp.float32)  # (B, 2H, 2W)


def _upsample_d_kernel(x_ref, md_ref, o_ref):
    # x: (B, D, K) f32   md: (2D, D)   o: (B, 2D, K)   K = 4*H*W (lane-dense)
    t = x_ref[...]
    B = t.shape[0]
    md_b = jnp.broadcast_to(md_ref[...], (B,) + tuple(md_ref.shape))
    o_ref[...] = jnp.einsum('bpd,bdk->bpk', md_b, t,
                            preferred_element_type=jnp.float32)


def linear_upsample_matrix(n_in):
    """1D linear-interp matrix (2n, n) for scale=2, align_corners=False (PyTorch)."""
    n_out = 2 * n_in
    dst = jnp.arange(n_out, dtype=jnp.float32)
    src = jnp.maximum((dst + 0.5) * 0.5 - 0.5, 0.0)
    i0 = jnp.floor(src).astype(jnp.int32)
    lam = src - i0.astype(jnp.float32)
    i1 = jnp.minimum(i0 + 1, n_in - 1)
    rows = jnp.arange(n_out)
    m = jnp.zeros((n_out, n_in), jnp.float32)
    m = m.at[rows, i0].add(1.0 - lam)
    m = m.at[rows, i1].add(lam)
    return m


def _group_membership(channels, groups):
    cpg = channels // groups
    gid = jnp.arange(channels, dtype=jnp.int32) // cpg
    return (gid[:, None] == gid[None, :]).astype(jnp.float32)


# ---------------------------------------------------------------------------
# DecoderModule forward
# ---------------------------------------------------------------------------
def decoder_forward(x, params, upsample=True, groups=2):
    # x: (N, C, D, H, W) float32 (NCDHW, PyTorch layout) — no transposes needed.
    x = x.astype(jnp.float32)
    N, C, D, H, W = x.shape
    inner = C // 2
    a_mat = _group_membership(inner, groups)

    for fparams, gparams in params["rev_blocks"]:
        x = reversible_block(x, fparams, gparams, a_mat, groups=groups)

    if not upsample:
        return x

    Cout = params["w1"].shape[0]
    S = D * H * W

    # ---- 1x1x1 conv + bias ----
    y = pl.pallas_call(
        _conv1x1_kernel,
        grid=(N,),
        in_specs=[
            pl.BlockSpec((1, C, S), lambda n: (n, 0, 0)),
            pl.BlockSpec((Cout, C), lambda n: (0, 0)),
            pl.BlockSpec((Cout, 1), lambda n: (0, 0)),
        ],
        out_specs=pl.BlockSpec((1, Cout, S), lambda n: (n, 0, 0)),
        out_shape=jax.ShapeDtypeStruct((N, Cout, S), jnp.float32),
        compiler_params=pltpu.CompilerParams(dimension_semantics=("parallel",)),
    )(x.reshape(N, C, S).astype(jnp.bfloat16),
      params["w1"].astype(jnp.bfloat16), params["b1"])

    # ---- separable trilinear x2 upsample ----
    md = linear_upsample_matrix(D)            # (2D, D)
    mh = linear_upsample_matrix(H)            # (2H, H)
    mwT = linear_upsample_matrix(W).T         # (W, 2W)

    # H and W axes; grid over batch, one sample's (Cout*D, H, W) slab per step.
    bhw = N * Cout * D
    z = y.reshape(bhw, H, W)                  # contiguous glue reshape (free)
    z = pl.pallas_call(
        _upsample_hw_kernel,
        grid=(N,),
        in_specs=[
            pl.BlockSpec((Cout * D, H, W), lambda n: (n, 0, 0)),
            pl.BlockSpec((2 * H, H), lambda n: (0, 0)),
            pl.BlockSpec((W, 2 * W), lambda n: (0, 0)),
        ],
        out_specs=pl.BlockSpec((Cout * D, 2 * H, 2 * W), lambda n: (n, 0, 0)),
        out_shape=jax.ShapeDtypeStruct((bhw, 2 * H, 2 * W), jnp.float32),
        compiler_params=pltpu.CompilerParams(dimension_semantics=("parallel",)),
    )(z, mh, mwT)

    # D axis; contiguous glue reshape merges (2H, 2W) into a lane-dense 4*H*W.
    khw = 4 * H * W
    u = z.reshape(N * Cout, D, khw)
    u = pl.pallas_call(
        _upsample_d_kernel,
        grid=(N,),
        in_specs=[
            pl.BlockSpec((Cout, D, khw), lambda n: (n, 0, 0)),
            pl.BlockSpec((2 * D, D), lambda n: (0, 0)),
        ],
        out_specs=pl.BlockSpec((Cout, 2 * D, khw), lambda n: (n, 0, 0)),
        out_shape=jax.ShapeDtypeStruct((N * Cout, 2 * D, khw), jnp.float32),
        compiler_params=pltpu.CompilerParams(dimension_semantics=("parallel",)),
    )(u, md)

    return u.reshape(N, Cout, 2 * D, 2 * H, 2 * W)   # NCDHW


# ---------------------------------------------------------------------------
# Deterministic parameter init (kaiming-style normal; GN affine = 1/0)
# ---------------------------------------------------------------------------
def make_params(key, in_channels, out_channels, depth):
    inner = in_channels // 2
    blocks = []
    for _ in range(depth):
        branch = []
        for _ in range(2):                            # F block, G block
            key, k1 = jax.random.split(key)
            std = (2.0 / (27 * inner)) ** 0.5
            # w_packed[cout, tap*inner + cin] == torch W[cout, cin, kd, kh, kw],
            # tap = kd*9 + kh*3 + kw.
            w_packed = jax.random.normal(k1, (inner, 27 * inner), jnp.float32) * std
            gamma = jnp.ones((inner, 1), jnp.float32)
            beta = jnp.zeros((inner, 1), jnp.float32)
            branch.append((w_packed, gamma, beta))
        blocks.append((branch[0], branch[1]))
    key, k1, k2 = jax.random.split(key, 3)
    w1 = jax.random.normal(k1, (out_channels, in_channels), jnp.float32) \
        * (2.0 / in_channels) ** 0.5
    b1 = jax.random.normal(k2, (out_channels, 1), jnp.float32) * 0.01
    return {"rev_blocks": blocks, "w1": w1, "b1": b1}


if __name__ == "__main__":
    N, IN_C, OUT_C, DEPTH = 2, 8, 4, 2
    D = H = W = 8

    key = jax.random.PRNGKey(0)
    key, kx, kp = jax.random.split(key, 3)
    x = jax.random.normal(kx, (N, IN_C, D, H, W), jnp.float32)   # NCDHW
    params = make_params(kp, IN_C, OUT_C, DEPTH)

    fwd = jax.jit(functools.partial(decoder_forward, upsample=True))
    out = jax.block_until_ready(fwd(x, params))

    assert out.shape == (N, OUT_C, 2 * D, 2 * H, 2 * W), out.shape
    assert bool(jnp.all(jnp.isfinite(out)))
    print("KERNEL_OK")
</pallas_src>

<mosaic_0001>
module attributes {stable_mosaic.version = 11 : i64} {
  func.func @_residual_inner_kernel(%arg0: i32, %arg1: memref<1x108x512xbf16, #tpu.memory_space<vmem>>, %arg2: memref<1x4x512xf32, #tpu.memory_space<vmem>>, %arg3: memref<4x108xbf16, #tpu.memory_space<vmem>>, %arg4: memref<4x1xf32, #tpu.memory_space<vmem>>, %arg5: memref<4x1xf32, #tpu.memory_space<vmem>>, %arg6: memref<4x4xf32, #tpu.memory_space<vmem>>, %arg7: memref<1x4x512xf32, #tpu.memory_space<vmem>>) attributes {dimension_semantics = [#tpu.dimension_semantics<parallel>], iteration_bounds = array<i64: 2>, scalar_prefetch = 0 : i64, scratch_operands = 0 : i64, tpu.core_type = #tpu.core_type<tc>, window_params = [{transform_indices = @transform_0, window_bounds = array<i64: 1, 108, 512>}, {transform_indices = @transform_1, window_bounds = array<i64: 1, 4, 512>}, {pipeline_mode = #tpu.pipeline_mode<synchronous>, transform_indices = @transform_2, window_bounds = array<i64: 4, 108>}, {pipeline_mode = #tpu.pipeline_mode<synchronous>, transform_indices = @transform_3, window_bounds = array<i64: 4, 1>}, {pipeline_mode = #tpu.pipeline_mode<synchronous>, transform_indices = @transform_4, window_bounds = array<i64: 4, 1>}, {pipeline_mode = #tpu.pipeline_mode<synchronous>, transform_indices = @transform_5, window_bounds = array<i64: 4, 4>}, {transform_indices = @transform_6, window_bounds = array<i64: 1, 4, 512>}]} {
    %c0 = arith.constant 0 : index
    %c0_0 = arith.constant 0 : index
    %0 = vector.load %arg3[%c0, %c0_0] : memref<4x108xbf16, #tpu.memory_space<vmem>>, vector<4x108xbf16>
    %c0_1 = arith.constant 0 : index
    %c0_2 = arith.constant 0 : index
    %c0_3 = arith.constant 0 : index
    %1 = vector.load %arg1[%c0_1, %c0_2, %c0_3] : memref<1x108x512xbf16, #tpu.memory_space<vmem>>, vector<1x108x512xbf16>
    %2 = vector.shape_cast %1 : vector<1x108x512xbf16> to vector<108x512xbf16>
    %cst = arith.constant dense<0.000000e+00> : vector<4x512xf32>
    %3 = tpu.matmul %0, %2, %cst {dimension_numbers = #tpu.dot_dimension_numbers<[1], [0], [0], [1], [0, 0, 1, 1], [], []>} : vector<4x108xbf16>, vector<108x512xbf16>, vector<4x512xf32> -> vector<4x512xf32>
    %cst_4 = arith.constant 0.000000e+00 : f32
    %4 = vector.broadcast %cst_4 : f32 to vector<4x512xf32>
    %5 = arith.cmpf ogt, %3, %4 : vector<4x512xf32>
    %cst_5 = arith.constant 0.00999999977 : f32
    %6 = vector.broadcast %cst_5 : f32 to vector<4x512xf32>
    %7 = arith.mulf %6, %3 : vector<4x512xf32>
    %8 = arith.select %5, %3, %7 : vector<4x512xi1>, vector<4x512xf32>
    %cst_6 = arith.constant dense<0.000000e+00> : vector<4xf32>
    %9 = vector.multi_reduction <add>, %8, %cst_6 [1] : vector<4x512xf32> to vector<4xf32>
    %10 = vector.shape_cast %9 : vector<4xf32> to vector<4x1xf32>
    %11 = arith.mulf %8, %8 : vector<4x512xf32>
    %cst_7 = arith.constant dense<0.000000e+00> : vector<4xf32>
    %12 = vector.multi_reduction <add>, %11, %cst_7 [1] : vector<4x512xf32> to vector<4xf32>
    %13 = vector.shape_cast %12 : vector<4xf32> to vector<4x1xf32>
    %c0_8 = arith.constant 0 : index
    %c0_9 = arith.constant 0 : index
    %14 = vector.load %arg6[%c0_8, %c0_9] : memref<4x4xf32, #tpu.memory_space<vmem>>, vector<4x4xf32>
    %cst_10 = arith.constant dense<0.000000e+00> : vector<4x1xf32>
    %15 = tpu.matmul %14, %10, %cst_10 {dimension_numbers = #tpu.dot_dimension_numbers<[1], [0], [0], [1], [0, 0, 1, 1], [], []>} : vector<4x4xf32>, vector<4x1xf32>, vector<4x1xf32> -> vector<4x1xf32>
    %c0_11 = arith.constant 0 : index
    %c0_12 = arith.constant 0 : index
    %16 = vector.load %arg6[%c0_11, %c0_12] : memref<4x4xf32, #tpu.memory_space<vmem>>, vector<4x4xf32>
    %cst_13 = arith.constant dense<0.000000e+00> : vector<4x1xf32>
    %17 = tpu.matmul %16, %13, %cst_13 {dimension_numbers = #tpu.dot_dimension_numbers<[1], [0], [0], [1], [0, 0, 1, 1], [], []>} : vector<4x4xf32>, vector<4x1xf32>, vector<4x1xf32> -> vector<4x1xf32>
    %cst_14 = arith.constant 1.024000e+03 : f32
    %18 = vector.broadcast %cst_14 : f32 to vector<4x1xf32>
    %19 = arith.divf %15, %18 : vector<4x1xf32>
    %cst_15 = arith.constant 1.024000e+03 : f32
    %20 = vector.broadcast %cst_15 : f32 to vector<4x1xf32>
    %21 = arith.divf %17, %20 : vector<4x1xf32>
    %22 = arith.mulf %19, %19 : vector<4x1xf32>
    %23 = arith.subf %21, %22 : vector<4x1xf32>
    %cst_16 = arith.constant 0.000000e+00 : f32
    %24 = vector.broadcast %cst_16 : f32 to vector<4x1xf32>
    %25 = arith.maximumf %23, %24 : vector<4x1xf32>
    %cst_17 = arith.constant 9.99999974E-6 : f32
    %26 = vector.broadcast %cst_17 : f32 to vector<4x1xf32>
    %27 = arith.addf %25, %26 : vector<4x1xf32>
    %28 = math.rsqrt %27 : vector<4x1xf32>
    %29 = vector.broadcast %19 : vector<4x1xf32> to vector<4x512xf32>
    %30 = arith.subf %8, %29 : vector<4x512xf32>
    %31 = vector.broadcast %28 : vector<4x1xf32> to vector<4x512xf32>
    %32 = arith.mulf %30, %31 : vector<4x512xf32>
    %c0_18 = arith.constant 0 : index
    %c0_19 = arith.constant 0 : index
    %33 = vector.load %arg4[%c0_18, %c0_19] : memref<4x1xf32, #tpu.memory_space<vmem>>, vector<4x1xf32>
    %34 = vector.broadcast %33 : vector<4x1xf32> to vector<4x512xf32>
    %35 = arith.mulf %32, %34 : vector<4x512xf32>
    %c0_20 = arith.constant 0 : index
    %c0_21 = arith.constant 0 : index
    %36 = vector.load %arg5[%c0_20, %c0_21] : memref<4x1xf32, #tpu.memory_space<vmem>>, vector<4x1xf32>
    %37 = vector.broadcast %36 : vector<4x1xf32> to vector<4x512xf32>
    %38 = arith.addf %35, %37 : vector<4x512xf32>
    %c0_22 = arith.constant 0 : index
    %c0_23 = arith.constant 0 : index
    %c0_24 = arith.constant 0 : index
    %39 = vector.load %arg2[%c0_22, %c0_23, %c0_24] : memref<1x4x512xf32, #tpu.memory_space<vmem>>, vector<1x4x512xf32>
    %40 = vector.shape_cast %39 : vector<1x4x512xf32> to vector<4x512xf32>
    %41 = arith.addf %38, %40 : vector<4x512xf32>
    %c0_25 = arith.constant 0 : index
    %c0_26 = arith.constant 0 : index
    %c0_27 = arith.constant 0 : index
    %42 = vector.load %arg7[%c0_25, %c0_26, %c0_27] : memref<1x4x512xf32, #tpu.memory_space<vmem>>, vector<1x4x512xf32>
    %43 = vector.shape_cast %42 : vector<1x4x512xf32> to vector<4x512xf32>
    %44 = vector.shape_cast %41 : vector<4x512xf32> to vector<1x4x512xf32>
    tpu.vector_store %arg7[%c0_25, %c0_26, %c0_27], %44 {strides = array<i32>} : memref<1x4x512xf32, #tpu.memory_space<vmem>>, vector<1x4x512xf32>,
    return
  }
  func.func @transform_0(%arg0: i32) -> (i32, i32, i32) {
    %c0_i32 = arith.constant 0 : i32
    %c0_i32_0 = arith.constant 0 : i32
    %c0_i32_1 = arith.constant 0 : i32
    return %arg0, %c0_i32, %c0_i32_0 : i32, i32, i32
  }
  func.func @transform_1(%arg0: i32) -> (i32, i32, i32) {
    %c0_i32 = arith.constant 0 : i32
    %c0_i32_0 = arith.constant 0 : i32
    %c0_i32_1 = arith.constant 0 : i32
    return %arg0, %c0_i32, %c0_i32_0 : i32, i32, i32
  }
  func.func @transform_2(%arg0: i32) -> (i32, i32) {
    %c0_i32 = arith.constant 0 : i32
    %c0_i32_0 = arith.constant 0 : i32
    %c0_i32_1 = arith.constant 0 : i32
    return %c0_i32, %c0_i32_0 : i32, i32
  }
  func.func @transform_3(%arg0: i32) -> (i32, i32) {
    %c0_i32 = arith.constant 0 : i32
    %c0_i32_0 = arith.constant 0 : i32
    %c0_i32_1 = arith.constant 0 : i32
    return %c0_i32, %c0_i32_0 : i32, i32
  }
  func.func @transform_4(%arg0: i32) -> (i32, i32) {
    %c0_i32 = arith.constant 0 : i32
    %c0_i32_0 = arith.constant 0 : i32
    %c0_i32_1 = arith.constant 0 : i32
    return %c0_i32, %c0_i32_0 : i32, i32
  }
  func.func @transform_5(%arg0: i32) -> (i32, i32) {
    %c0_i32 = arith.constant 0 : i32
    %c0_i32_0 = arith.constant 0 : i32
    %c0_i32_1 = arith.constant 0 : i32
    return %c0_i32, %c0_i32_0 : i32, i32
  }
  func.func @transform_6(%arg0: i32) -> (i32, i32, i32) {
    %c0_i32 = arith.constant 0 : i32
    %c0_i32_0 = arith.constant 0 : i32
    %c0_i32_1 = arith.constant 0 : i32
    return %arg0, %c0_i32, %c0_i32_0 : i32, i32, i32
  }
}

module attributes {stable_mosaic.version = 11 : i64} {
  func.func @_conv1x1_kernel(%arg0: i32, %arg1: memref<1x8x512xbf16, #tpu.memory_space<vmem>>, %arg2: memref<4x8xbf16, #tpu.memory_space<vmem>>, %arg3: memref<4x1xf32, #tpu.memory_space<vmem>>, %arg4: memref<1x4x512xf32, #tpu.memory_space<vmem>>) attributes {dimension_semantics = [#tpu.dimension_semantics<parallel>], iteration_bounds = array<i64: 2>, scalar_prefetch = 0 : i64, scratch_operands = 0 : i64, tpu.core_type = #tpu.core_type<tc>, window_params = [{transform_indices = @transform_0, window_bounds = array<i64: 1, 8, 512>}, {pipeline_mode = #tpu.pipeline_mode<synchronous>, transform_indices = @transform_1, window_bounds = array<i64: 4, 8>}, {pipeline_mode = #tpu.pipeline_mode<synchronous>, transform_indices = @transform_2, window_bounds = array<i64: 4, 1>}, {transform_indices = @transform_3, window_bounds = array<i64: 1, 4, 512>}]} {
    %c0 = arith.constant 0 : index
    %c0_0 = arith.constant 0 : index
    %0 = vector.load %arg2[%c0, %c0_0] : memref<4x8xbf16, #tpu.memory_space<vmem>>, vector<4x8xbf16>
    %c0_1 = arith.constant 0 : index
    %c0_2 = arith.constant 0 : index
    %c0_3 = arith.constant 0 : index
    %1 = vector.load %arg1[%c0_1, %c0_2, %c0_3] : memref<1x8x512xbf16, #tpu.memory_space<vmem>>, vector<1x8x512xbf16>
    %2 = vector.shape_cast %1 : vector<1x8x512xbf16> to vector<8x512xbf16>
    %cst = arith.constant dense<0.000000e+00> : vector<4x512xf32>
    %3 = tpu.matmul %0, %2, %cst {dimension_numbers = #tpu.dot_dimension_numbers<[1], [0], [0], [1], [0, 0, 1, 1], [], []>} : vector<4x8xbf16>, vector<8x512xbf16>, vector<4x512xf32> -> vector<4x512xf32>
    %c0_4 = arith.constant 0 : index
    %c0_5 = arith.constant 0 : index
    %4 = vector.load %arg3[%c0_4, %c0_5] : memref<4x1xf32, #tpu.memory_space<vmem>>, vector<4x1xf32>
    %5 = vector.broadcast %4 : vector<4x1xf32> to vector<4x512xf32>
    %6 = arith.addf %3, %5 : vector<4x512xf32>
    %c0_6 = arith.constant 0 : index
    %c0_7 = arith.constant 0 : index
    %c0_8 = arith.constant 0 : index
    %7 = vector.load %arg4[%c0_6, %c0_7, %c0_8] : memref<1x4x512xf32, #tpu.memory_space<vmem>>, vector<1x4x512xf32>
    %8 = vector.shape_cast %7 : vector<1x4x512xf32> to vector<4x512xf32>
    %9 = vector.shape_cast %6 : vector<4x512xf32> to vector<1x4x512xf32>
    tpu.vector_store %arg4[%c0_6, %c0_7, %c0_8], %9 {strides = array<i32>} : memref<1x4x512xf32, #tpu.memory_space<vmem>>, vector<1x4x512xf32>,
    return
  }
  func.func @transform_0(%arg0: i32) -> (i32, i32, i32) {
    %c0_i32 = arith.constant 0 : i32
    %c0_i32_0 = arith.constant 0 : i32
    %c0_i32_1 = arith.constant 0 : i32
    return %arg0, %c0_i32, %c0_i32_0 : i32, i32, i32
  }
  func.func @transform_1(%arg0: i32) -> (i32, i32) {
    %c0_i32 = arith.constant 0 : i32
    %c0_i32_0 = arith.constant 0 : i32
    %c0_i32_1 = arith.constant 0 : i32
    return %c0_i32, %c0_i32_0 : i32, i32
  }
  func.func @transform_2(%arg0: i32) -> (i32, i32) {
    %c0_i32 = arith.constant 0 : i32
    %c0_i32_0 = arith.constant 0 : i32
    %c0_i32_1 = arith.constant 0 : i32
    return %c0_i32, %c0_i32_0 : i32, i32
  }
  func.func @transform_3(%arg0: i32) -> (i32, i32, i32) {
    %c0_i32 = arith.constant 0 : i32
    %c0_i32_0 = arith.constant 0 : i32
    %c0_i32_1 = arith.constant 0 : i32
    return %arg0, %c0_i32, %c0_i32_0 : i32, i32, i32
  }
}

module attributes {stable_mosaic.version = 11 : i64} {
  func.func @_upsample_hw_kernel(%arg0: i32, %arg1: memref<32x8x8xf32, #tpu.memory_space<vmem>>, %arg2: memref<16x8xf32, #tpu.memory_space<vmem>>, %arg3: memref<8x16xf32, #tpu.memory_space<vmem>>, %arg4: memref<32x16x16xf32, #tpu.memory_space<vmem>>) attributes {dimension_semantics = [#tpu.dimension_semantics<parallel>], iteration_bounds = array<i64: 2>, scalar_prefetch = 0 : i64, scratch_operands = 0 : i64, tpu.core_type = #tpu.core_type<tc>, window_params = [{transform_indices = @transform_0, window_bounds = array<i64: 32, 8, 8>}, {pipeline_mode = #tpu.pipeline_mode<synchronous>, transform_indices = @transform_1, window_bounds = array<i64: 16, 8>}, {pipeline_mode = #tpu.pipeline_mode<synchronous>, transform_indices = @transform_2, window_bounds = array<i64: 8, 16>}, {transform_indices = @transform_3, window_bounds = array<i64: 32, 16, 16>}]} {
    %c0 = arith.constant 0 : index
    %c0_0 = arith.constant 0 : index
    %c0_1 = arith.constant 0 : index
    %0 = vector.load %arg1[%c0, %c0_0, %c0_1] : memref<32x8x8xf32, #tpu.memory_space<vmem>>, vector<32x8x8xf32>
    %c0_2 = arith.constant 0 : index
    %c0_3 = arith.constant 0 : index
    %1 = vector.load %arg2[%c0_2, %c0_3] : memref<16x8xf32, #tpu.memory_space<vmem>>, vector<16x8xf32>
    %2 = vector.shape_cast %1 : vector<16x8xf32> to vector<1x16x8xf32>
    %3 = vector.broadcast %2 : vector<1x16x8xf32> to vector<32x16x8xf32>
    "tpu.trace_start"() <{level = 10 : i32, message = "bph,bhw->bpw"}> : () -> ()
    %cst = arith.constant dense<0.000000e+00> : vector<32x16x8xf32>
    %4 = tpu.matmul %3, %0, %cst {dimension_numbers = #tpu.dot_dimension_numbers<[2], [1], [1], [2], [0, 0, 0, 1, 1, 2], [0], [0]>} : vector<32x16x8xf32>, vector<32x8x8xf32>, vector<32x16x8xf32> -> vector<32x16x8xf32>
    "tpu.trace_stop"() : () -> ()
    %c0_4 = arith.constant 0 : index
    %c0_5 = arith.constant 0 : index
    %5 = vector.load %arg3[%c0_4, %c0_5] : memref<8x16xf32, #tpu.memory_space<vmem>>, vector<8x16xf32>
    %6 = vector.shape_cast %5 : vector<8x16xf32> to vector<1x8x16xf32>
    %7 = vector.broadcast %6 : vector<1x8x16xf32> to vector<32x8x16xf32>
    "tpu.trace_start"() <{level = 10 : i32, message = "bhw,bwq->bhq"}> : () -> ()
    %cst_6 = arith.constant dense<0.000000e+00> : vector<32x16x16xf32>
    %8 = tpu.matmul %4, %7, %cst_6 {dimension_numbers = #tpu.dot_dimension_numbers<[2], [1], [1], [2], [0, 0, 0, 1, 1, 2], [0], [0]>} : vector<32x16x8xf32>, vector<32x8x16xf32>, vector<32x16x16xf32> -> vector<32x16x16xf32>
    "tpu.trace_stop"() : () -> ()
    %c0_7 = arith.constant 0 : index
    %c0_8 = arith.constant 0 : index
    %c0_9 = arith.constant 0 : index
    %9 = vector.load %arg4[%c0_7, %c0_8, %c0_9] : memref<32x16x16xf32, #tpu.memory_space<vmem>>, vector<32x16x16xf32>
    tpu.vector_store %arg4[%c0_7, %c0_8, %c0_9], %8 {strides = array<i32>} : memref<32x16x16xf32, #tpu.memory_space<vmem>>, vector<32x16x16xf32>,
    return
  }
  func.func @transform_0(%arg0: i32) -> (i32, i32, i32) {
    %c0_i32 = arith.constant 0 : i32
    %c0_i32_0 = arith.constant 0 : i32
    %c0_i32_1 = arith.constant 0 : i32
    return %arg0, %c0_i32, %c0_i32_0 : i32, i32, i32
  }
  func.func @transform_1(%arg0: i32) -> (i32, i32) {
    %c0_i32 = arith.constant 0 : i32
    %c0_i32_0 = arith.constant 0 : i32
    %c0_i32_1 = arith.constant 0 : i32
    return %c0_i32, %c0_i32_0 : i32, i32
  }
  func.func @transform_2(%arg0: i32) -> (i32, i32) {
    %c0_i32 = arith.constant 0 : i32
    %c0_i32_0 = arith.constant 0 : i32
    %c0_i32_1 = arith.constant 0 : i32
    return %c0_i32, %c0_i32_0 : i32, i32
  }
  func.func @transform_3(%arg0: i32) -> (i32, i32, i32) {
    %c0_i32 = arith.constant 0 : i32
    %c0_i32_0 = arith.constant 0 : i32
    %c0_i32_1 = arith.constant 0 : i32
    return %arg0, %c0_i32, %c0_i32_0 : i32, i32, i32
  }
}

module attributes {stable_mosaic.version = 11 : i64} {
  func.func @_upsample_d_kernel(%arg0: i32, %arg1: memref<4x8x256xf32, #tpu.memory_space<vmem>>, %arg2: memref<16x8xf32, #tpu.memory_space<vmem>>, %arg3: memref<4x16x256xf32, #tpu.memory_space<vmem>>) attributes {dimension_semantics = [#tpu.dimension_semantics<parallel>], iteration_bounds = array<i64: 2>, scalar_prefetch = 0 : i64, scratch_operands = 0 : i64, tpu.core_type = #tpu.core_type<tc>, window_params = [{transform_indices = @transform_0, window_bounds = array<i64: 4, 8, 256>}, {pipeline_mode = #tpu.pipeline_mode<synchronous>, transform_indices = @transform_1, window_bounds = array<i64: 16, 8>}, {transform_indices = @transform_2, window_bounds = array<i64: 4, 16, 256>}]} {
    %c0 = arith.constant 0 : index
    %c0_0 = arith.constant 0 : index
    %c0_1 = arith.constant 0 : index
    %0 = vector.load %arg1[%c0, %c0_0, %c0_1] : memref<4x8x256xf32, #tpu.memory_space<vmem>>, vector<4x8x256xf32>
    %c0_2 = arith.constant 0 : index
    %c0_3 = arith.constant 0 : index
    %1 = vector.load %arg2[%c0_2, %c0_3] : memref<16x8xf32, #tpu.memory_space<vmem>>, vector<16x8xf32>
    %2 = vector.shape_cast %1 : vector<16x8xf32> to vector<1x16x8xf32>
    %3 = vector.broadcast %2 : vector<1x16x8xf32> to vector<4x16x8xf32>
    "tpu.trace_start"() <{level = 10 : i32, message = "bpd,bdk->bpk"}> : () -> ()
    %cst = arith.constant dense<0.000000e+00> : vector<4x16x256xf32>
    %4 = tpu.matmul %3, %0, %cst {dimension_numbers = #tpu.dot_dimension_numbers<[2], [1], [1], [2], [0, 0, 0, 1, 1, 2], [0], [0]>} : vector<4x16x8xf32>, vector<4x8x256xf32>, vector<4x16x256xf32> -> vector<4x16x256xf32>
    "tpu.trace_stop"() : () -> ()
    %c0_4 = arith.constant 0 : index
    %c0_5 = arith.constant 0 : index
    %c0_6 = arith.constant 0 : index
    %5 = vector.load %arg3[%c0_4, %c0_5, %c0_6] : memref<4x16x256xf32, #tpu.memory_space<vmem>>, vector<4x16x256xf32>
    tpu.vector_store %arg3[%c0_4, %c0_5, %c0_6], %4 {strides = array<i32>} : memref<4x16x256xf32, #tpu.memory_space<vmem>>, vector<4x16x256xf32>,
    return
  }
  func.func @transform_0(%arg0: i32) -> (i32, i32, i32) {
    %c0_i32 = arith.constant 0 : i32
    %c0_i32_0 = arith.constant 0 : i32
    %c0_i32_1 = arith.constant 0 : i32
    return %arg0, %c0_i32, %c0_i32_0 : i32, i32, i32
  }
  func.func @transform_1(%arg0: i32) -> (i32, i32) {
    %c0_i32 = arith.constant 0 : i32
    %c0_i32_0 = arith.constant 0 : i32
    %c0_i32_1 = arith.constant 0 : i32
    return %c0_i32, %c0_i32_0 : i32, i32
  }
  func.func @transform_2(%arg0: i32) -> (i32, i32, i32) {
    %c0_i32 = arith.constant 0 : i32
    %c0_i32_0 = arith.constant 0 : i32
    %c0_i32_1 = arith.constant 0 : i32
    return %arg0, %c0_i32, %c0_i32_0 : i32, i32, i32
  }
}

</mosaic_0001>

<bundles_post_ra>
// kernel: decoder_forward.7
= control target key start
LH: loop header
LB: loop body
LE: loop exit
PB: predicated region body
PF: predicated region fallthrough
CT: control target
= control target key end

     0   :  { %s977_s21 = smov 0   ;;  %s1115_s0 = inlined_call_operand.vmem [shape: bf16[2,108,512], index: 0, kind: input, shape index: {}]   ;;  %s1116_s1 = inlined_call_operand.vmem [shape: f32[2,4,512], index: 1, kind: input, shape index: {}]   ;;  %s1117_s2 = inlined_call_operand.vmem [shape: bf16[4,108], index: 2, kind: input, shape index: {}]   ;;  %s1118_s3 = inlined_call_operand.vmem [shape: f32[4,1], index: 3, kind: input, shape index: {}]   ;;  %s1119_s4 = inlined_call_operand.vmem [shape: f32[4,1], index: 4, kind: input, shape index: {}]   ;;  %s1120_s5 = inlined_call_operand.vmem [shape: f32[4,4], index: 5, kind: input, shape index: {}]   ;;  %s1121_s6 = inlined_call_operand.vmem [shape: f32[2,4,512], index: 6, kind: output, shape index: {}]  }
   0x1 LB: > { %s752_s22 = sadd.s32 4294967295, %s938_s21   ;;  %p756_p0 = scmp.ge.s32.totalorder %s938_s21, 1  ;;  %s938_s21 = sphi %s977_s21, %s16_s21  }
   0x2   : > { %p222_p1 = scmp.lt.s32.totalorder %s938_s21, 3 }
   0x4   : > { %p223_p2 = pnand %p756_p0, %p222_p1 }
   0x5   : > { %p257_p3 = scmp.lt.s32.totalorder (!%p223_p2), %s752_s22, 1 }
   0x6   : > { %226 = sbr.rel (%p223_p2) target bundleno = 592 (0x250), region = 44 }
   0xb   : > { %s1123_s22 = smov (!%p257_p3, %s752_s22), 1  ;;  %vm442_vm0 = vcmask 1045504   ;;  %vm438_vm1 = vcmask 883712   ;;  %vm519_vm4 = vcmask 1043456   ;;  %vm543_vm7 = vcmask 31744  }
   0xc   : > { %s914_s23 = smul.u32 224, %s1123_s22  ;;  %s884_s11 = sshll.u32 %s1123_s22, 4 }
   0xd   : > { %s266_s14 = scalar_lea.vmem %s1116_s1, %s884_s11  ;;  %s271_s17 = scalar_lea.vmem %s1121_s6, %s884_s11 }
   0xe   : > { %s991_s26 = scalar_lea.vmem %s1115_s0, %s914_s23 }
   0xf   : > { %v860_v0 = vld [vmem:[%s991_s26 + $0xc0] sm:$0xf]  ;;  %v912_v1 = vld [vmem:[%s991_s26 + $0xcc] sm:$0x30]  ;;  %v910_v2 = vld [vmem:[%s991_s26 + $0xc4] sm:$0xf] }
  0x10   : > { %v861_v3 = vor.u32 %v912_v1, %v860_v0  ;;  %v862_v4 = vld [vmem:[%s991_s26 + $0xd0] sm:$0x30]  ;;  %v868_v5 = vld [vmem:[%s991_s26 + $0xc8] sm:$0xf]  ;;  %v913_v6 = vld [vmem:[%s991_s26 + $0xd4] sm:$0x30] }
  0x11   : > { %v865_v7 = vor.u32 %v910_v2, %v862_v4  ;;  %v869_v8 = vor.u32 %v913_v6, %v868_v5  ;;  %v911_v9 = vld [vmem:[%s991_s26 + $0xcc] sm:$0xf]  ;;  %v870_v10 = vld [vmem:[%s991_s26 + $0xd8] sm:$0x30]  ;;  %v844_v11 = vld [vmem:[%s991_s26 + $0xa0] sm:$0xf] }
  0x12   : > { %v444_v12 = vsel %vm442_vm0, %v861_v3, 0  ;;  %v873_v13 = vor.u32 %v911_v9, %v870_v10  ;;  %v908_v14 = vld [vmem:[%s991_s26 + $0xac] sm:$0xf0]  ;;  %v906_v15 = vld [vmem:[%s991_s26 + $0xa4] sm:$0xf] }
  0x13   : > { %456 = vmatpush.bf16.msra.mxu0 %v444_v12  ;;  %v447_v16 = vsel %vm442_vm0, %v865_v7, 0  ;;  %v450_v17 = vsel %vm442_vm0, %v869_v8, 0  ;;  %v845_v18 = vor.u32 %v908_v14, %v844_v11  ;;  %v846_v19 = vld [vmem:[%s991_s26 + $0xb0] sm:$0xf0]  ;;  %v852_v20 = vld [vmem:[%s991_s26 + $0xa8] sm:$0xf] }
  0x14   : > { %469 = vmatpush.bf16.msra.mxu1 %v447_v16  ;;  %482 = vmatpush.bf16.msra.mxu2 %v450_v17  ;;  %v453_v21 = vsel %vm442_vm0, %v873_v13, 0  ;;  %v849_v22 = vor.u32 %v906_v15, %v846_v19  ;;  %v909_v23 = vld [vmem:[%s991_s26 + $0xb4] sm:$0xf0]  ;;  %v907_v24 = vld [vmem:[%s991_s26 + $0xac] sm:$0xf] }
  0x15   : > { %495 = vmatpush.bf16.msra.mxu3 %v453_v21  ;;  %v853_v25 = vor.u32 %v909_v23, %v852_v20  ;;  %v854_v26 = vld [vmem:[%s991_s26 + $0xb8] sm:$0xf0]  ;;  %v828_v27 = vld [vmem:[%s991_s26 + $0x80] sm:$0xf]  ;;  %v904_v28 = vld [vmem:[%s991_s26 + $0x8c] sm:$0xf0] }
  0x16   : > { %v857_v29 = vor.u32 %v907_v24, %v854_v26  ;;  %v902_v30 = vld [vmem:[%s991_s26 + $0x84] sm:$0xf]  ;;  %v830_v31 = vld [vmem:[%s991_s26 + $0x90] sm:$0xf0]  ;;  %v836_v32 = vld [vmem:[%s991_s26 + $0x88] sm:$0xf]  ;;  %v829_v33 = vor.u32 %v904_v28, %v828_v27 }
  0x17   : > { %457 = vmatpush.bf16.msra.mxu0 %v845_v18  ;;  %v905_v34 = vld [vmem:[%s991_s26 + $0x94] sm:$0xf0]  ;;  %v903_v35 = vld [vmem:[%s991_s26 + $0x8c] sm:$0xf]  ;;  %v838_v36 = vld [vmem:[%s991_s26 + $0x98] sm:$0xf0]  ;;  %v833_v37 = vor.u32 %v902_v30, %v830_v31 }
  0x18   : > { %470 = vmatpush.bf16.msra.mxu1 %v849_v22  ;;  %483 = vmatpush.bf16.msra.mxu2 %v853_v25  ;;  %v837_v38 = vor.u32 %v905_v34, %v836_v32  ;;  %v812_v39 = vld [vmem:[%s991_s26 + $0x60] sm:$0xf]  ;;  %v900_v40 = vld [vmem:[%s991_s26 + $0x6c] sm:$0xf0]  ;;  %v898_v41 = vld [vmem:[%s991_s26 + $0x64] sm:$0xf]  ;;  %v841_v42 = vor.u32 %v903_v35, %v838_v36 }
  0x19   : > { %496 = vmatpush.bf16.msra.mxu3 %v857_v29  ;;  %v814_v43 = vld [vmem:[%s991_s26 + $0x70] sm:$0xf0]  ;;  %v820_v44 = vld [vmem:[%s991_s26 + $0x68] sm:$0xf]  ;;  %v901_v45 = vld [vmem:[%s991_s26 + $0x74] sm:$0xf0]  ;;  %v813_v48 = vor.u32 %v900_v40, %v812_v39 }
  0x1a   : > { %v899_v46 = vld [vmem:[%s991_s26 + $0x6c] sm:$0xf]  ;;  %v822_v47 = vld [vmem:[%s991_s26 + $0x78] sm:$0xf0]  ;;  %v817_v49 = vor.u32 %v898_v41, %v814_v43  ;;  %v821_v50 = vor.u32 %v901_v45, %v820_v44  ;;  %v796_v51 = vld [vmem:[%s991_s26 + $0x40] sm:$0xf] }
  0x1b   : > { %458 = vmatpush.bf16.msra.mxu0 %v829_v33  ;;  %v896_v52 = vld [vmem:[%s991_s26 + $0x4c] sm:$0xf0]  ;;  %v894_v53 = vld [vmem:[%s991_s26 + $0x44] sm:$0xf]  ;;  %v825_v54 = vor.u32 %v899_v46, %v822_v47  ;;  %v798_v55 = vld [vmem:[%s991_s26 + $0x50] sm:$0xf0] }
  0x1c   : > { %471 = vmatpush.bf16.msra.mxu1 %v833_v37  ;;  %484 = vmatpush.bf16.msra.mxu2 %v837_v38  ;;  %v804_v56 = vld [vmem:[%s991_s26 + $0x48] sm:$0xf]  ;;  %v897_v57 = vld [vmem:[%s991_s26 + $0x54] sm:$0xf0]  ;;  %v895_v58 = vld [vmem:[%s991_s26 + $0x4c] sm:$0xf]  ;;  %v797_v60 = vor.u32 %v896_v52, %v796_v51  ;;  %v801_v61 = vor.u32 %v894_v53, %v798_v55 }
  0x1d   : > { %497 = vmatpush.bf16.msra.mxu3 %v841_v42  ;;  %v806_v59 = vld [vmem:[%s991_s26 + $0x58] sm:$0xf0]  ;;  %v805_v62 = vor.u32 %v897_v57, %v804_v56  ;;  %v780_v63 = vld [vmem:[%s991_s26 + $0x20] sm:$0xf]  ;;  %v892_v0 = vld [vmem:[%s991_s26 + $0x2c] sm:$0xf0] }
  0x1e   : > { %v890_v1 = vld [vmem:[%s991_s26 + $0x24] sm:$0xf]  ;;  %v809_v2 = vor.u32 %v895_v58, %v806_v59  ;;  %v782_v3 = vld [vmem:[%s991_s26 + $0x30] sm:$0xf0]  ;;  %v788_v4 = vld [vmem:[%s991_s26 + $0x28] sm:$0xf]  ;;  %v781_v8 = vor.u32 %v892_v0, %v780_v63 }
  0x1f   : > { %459 = vmatpush.bf16.msra.mxu0 %v813_v48  ;;  %v893_v5 = vld [vmem:[%s991_s26 + $0x34] sm:$0xf0]  ;;  %v891_v6 = vld [vmem:[%s991_s26 + $0x2c] sm:$0xf]  ;;  %v790_v7 = vld [vmem:[%s991_s26 + $0x38] sm:$0xf0]  ;;  %v785_v9 = vor.u32 %v890_v1, %v782_v3 }
  0x20   : > { %472 = vmatpush.bf16.msra.mxu1 %v817_v49  ;;  %485 = vmatpush.bf16.msra.mxu2 %v821_v50  ;;  %v789_v10 = vor.u32 %v893_v5, %v788_v4  ;;  %v764_v11 = vld [vmem:[%s991_s26] sm:$0xf]  ;;  %v888_v12 = vld [vmem:[%s991_s26 + $0xc] sm:$0xf0]  ;;  %v886_v13 = vld [vmem:[%s991_s26 + $0x4] sm:$0xf]  ;;  %v793_v14 = vor.u32 %v891_v6, %v790_v7 }
  0x21   : > { %498 = vmatpush.bf16.msra.mxu3 %v825_v54  ;;  %v766_v15 = vld [vmem:[%s991_s26 + $0x10] sm:$0xf0]  ;;  %v772_v16 = vld [vmem:[%s991_s26 + $0x8] sm:$0xf]  ;;  %v889_v17 = vld [vmem:[%s991_s26 + $0x14] sm:$0xf0]  ;;  %v765_v20 = vor.u32 %v888_v12, %v764_v11 }
  0x22   : > { %v887_v18 = vld [vmem:[%s991_s26 + $0xc] sm:$0xf]  ;;  %v774_v19 = vld [vmem:[%s991_s26 + $0x18] sm:$0xf0]  ;;  %v769_v21 = vor.u32 %v886_v13, %v766_v15  ;;  %v773_v22 = vor.u32 %v889_v17, %v772_v16  ;;  %v273_v24 = vld [vmem:[%s1117_s2] sm:$0x3] }
  0x23   : > { %460 = vmatpush.bf16.msra.mxu0 %v797_v60  ;;  %v777_v23 = vor.u32 %v887_v18, %v774_v19  ;;  %v542_v59 = vld [vmem:[%s1120_s5] sm:$0xf]  ;;  %v941_v63 = vmov 1024.0  }
  0x24   : > { %473 = vmatpush.bf16.msra.mxu1 %v801_v61  ;;  %486 = vmatpush.bf16.msra.mxu2 %v805_v62  ;;  %v940_v62 = vmov 0   ;;  %928 = vrcp.f32 %v941_v63  ;;  %v644_v12 = vld [vmem:[%s1119_s4] sm:$0xf] }
  0x25   : > { %499 = vmatpush.bf16.msra.mxu3 %v809_v2  ;;  %925 = vset.pattern.permute.xlu1 %v940_v62 }
  0x26   : > { %926 = vset.pattern.permute.xlu2 %v940_v62  ;;  %927 = vset.pattern.permute.xlu0 %v940_v62 }
  0x27   : > { %461 = vmatpush.bf16.msra.mxu0 %v781_v8  ;;  %v634_v8 = vld [vmem:[%s1118_s3] sm:$0xf] }
  0x28   : > { %474 = vmatpush.bf16.msra.mxu1 %v785_v9  ;;  %487 = vmatpush.bf16.msra.mxu2 %v789_v10 }
  0x29   : > { %500 = vmatpush.bf16.msra.mxu3 %v793_v14  ;;  %637 = vperm.xlu2 %926, %v634_v8  }
  0x2a   : > { %v929_v0 = vpop.eup %928 }
  0x2b   : > { %462 = vmatpush.bf16.msra.mxu0 %v765_v20  ;;  %v594_v1 = vmul.f32 1024.0, %v929_v0  ;;  %vm598_vm8 = vweird.f32 %v929_v0 }
  0x2c   : > { %475 = vmatpush.bf16.msra.mxu1 %v769_v21  ;;  %488 = vmatpush.bf16.msra.mxu2 %v773_v22 }
  0x2d   : > { %501 = vmatpush.bf16.msra.mxu3 %v777_v23  ;;  %v595_v2 = vsub.f32 1.0, %v594_v1  ;;  %v654_v23 = vld [vmem:[%s266_s14] sm:$0xff] }
  0x2e   : > { %874 = vmatmul.msk.bf16.vlgmr.msra.gmra.mxu0 %vm438_vm1, %v273_v24  ;;  %658 = vst [vmem:[#allocation1] ss:$2 sm:$0xff] %v654_v23 }
  0x2f   : > { %875 = vmatmul.msk.bf16.vlgmr.msra.gmra.mxu1 %vm438_vm1, %v273_v24  ;;  %876 = vmatmul.msk.bf16.vlgmr.msra.gmra.mxu2 %vm438_vm1, %v273_v24  ;;  %v596_v3 = vmul.f32 %v929_v0, %v595_v2 }
  0x30   : > { %877 = vmatmul.msk.bf16.vlgmr.msra.gmra.mxu3 %vm438_vm1, %v273_v24  ;;  %v655_v24 = vld [vmem:[%s266_s14 + $0x8] sm:$0xff] }
  0x31   : > { %v597_v4 = vadd.f32 %v929_v0, %v596_v3  ;;  %647 = vperm.xlu2 %926, %v644_v12   ;;  %660 = vst [vmem:[#allocation1 + $0x10] ss:$2 sm:$0xff] %v655_v24 }
  0x33   : > { %v599_v5 = vsel %vm598_vm8, %v929_v0, %v597_v4 }
  0xab   : > { %v464_v25 = vpop.f32.mrf.mxu0 }
  0xac   : > { %vm507_vm2 = vcmp.gt.f32.partialorder %v464_v25, 0.0  ;;  %v511_v26 = vmul.f32 0.01, %v464_v25  ;;  %v477_v27 = vpop.f32.mrf.mxu1 }
  0xad   : > { %vm508_vm3 = vcmp.gt.f32.partialorder %v477_v27, 0.0  ;;  %v512_v28 = vmul.f32 0.01, %v477_v27 }
  0xae   : > { %v1056_v29 = vsel %vm507_vm2, %v464_v25, %v511_v26  ;;  %v638_v26 = vpop.permute.xlu2 %637 }
  0xaf   : > { %v1058_v30 = vsel %vm508_vm3, %v477_v27, %v512_v28  ;;  %v520_v32 = vsel %vm519_vm4, %v1056_v29, 0.0  ;;  %v529_v37 = vmul.f32 %v1056_v29, %v1056_v29 }
  0xb0   : > { %v521_v33 = vsel %vm519_vm4, %v1058_v30, 0.0  ;;  %v530_v38 = vmul.f32 %v1058_v30, %v1058_v30 }
  0xb1   : > { %v522_v42 = vadd.f32 %v521_v33, %v520_v32  ;;  %v533_v48 = vsel %vm519_vm4, %v529_v37, 0.0 }
  0xb2   : > { %v490_v31 = vpop.f32.mrf.mxu2  ;;  %v534_v49 = vsel %vm519_vm4, %v530_v38, 0.0 }
  0xb3   : > { %vm509_vm5 = vcmp.gt.f32.partialorder %v490_v31, 0.0  ;;  %v513_v34 = vmul.f32 0.01, %v490_v31  ;;  %v503_v35 = vpop.f32.mrf.mxu3  ;;  %v466_v36 = vpop.f32.mrf.mxu0  ;;  %v535_v54 = vadd.f32 %v534_v49, %v533_v48  ;;  %v663_v49 = vld.sshfl [vmem:[#allocation1 + $0x10] sm:$0xff pattern:$0x75316420] }
  0xb4   : > { %vm510_vm6 = vcmp.gt.f32.partialorder %v503_v35, 0.0  ;;  %v514_v39 = vmul.f32 0.01, %v503_v35  ;;  %v479_v40 = vpop.f32.mrf.mxu1 }
  0xb5   : > { %v1068_v41 = vsel %vm509_vm5, %v490_v31, %v513_v34 }
  0xb6   : > { %v531_v43 = vmul.f32 %v1068_v41, %v1068_v41  ;;  %v1072_v44 = vsel %vm510_vm6, %v503_v35, %v514_v39  ;;  %v523_v45 = vsel %vm519_vm4, %v1068_v41, 0.0 }
  0xb7   : > { %v524_v46 = vadd.f32 %v523_v45, %v522_v42  ;;  %v525_v47 = vsel %vm519_vm4, %v1072_v44, 0.0  ;;  %v532_v55 = vmul.f32 %v1072_v44, %v1072_v44  ;;  %v662_v45 = vld.sshfl [vmem:[#allocation1 + $0x8] sm:$0xff pattern:$0x75316420] }
  0xb8   : > { %v536_v52 = vsel %vm519_vm4, %v531_v43, 0.0  ;;  %v648_v43 = vpop.permute.xlu2 %647 }
  0xb9   : > { %v526_v50 = vadd.f32 %v525_v47, %v524_v46  ;;  %v537_v56 = vadd.f32 %v536_v52, %v535_v54  ;;  %v538_v57 = vsel %vm519_vm4, %v532_v55, 0.0  ;;  %v664_v46 = vld.sshfl [vmem:[#allocation1 + $0x18] sm:$0xff pattern:$0x75316420] }
  0xba   : > { %v492_v51 = vpop.f32.mrf.mxu2 }
  0xbb   : > { %v505_v53 = vpop.f32.mrf.mxu3  ;;  %527 = vadd.xlane.f32.xlu0 %v526_v50  ;;  %v539_v58 = vadd.f32 %v538_v57, %v537_v56 }
  0xc3   : > { %540 = vadd.xlane.f32.xlu0 %v539_v58 }
 0x12e   : > { %v528_v60 = vpop.xlane.xlu0 %527 }
 0x12f   : > { %878 = vmatpush.msk.msrb.mxu0 %vm519_vm4, %v528_v60 }
 0x130   : > { %879 = vmatmul.msk.f32.vlgmr.msrb.gmra.mxu0 %vm543_vm7, %v542_v59 }
 0x136   : > { %v541_v61 = vpop.xlane.xlu0 %540 }
 0x137   : > { %880 = vmatpush.msk.msrb.mxu1 %vm519_vm4, %v541_v61 }
 0x138   : > { %881 = vmatmul.msk.f32.vlgmr.msrb.gmra.mxu1 %vm543_vm7, %v542_v59 }
 0x1ad   : > { %v567_v6 = vpop.f32.mrf.mxu0 }
 0x1ae   : > { %v600_v7 = vmul.f32 %v599_v5, %v567_v6 }
 0x1b0   : > { %618 = vperm.xlu1 %925, %v600_v7   ;;  %v602_v9 = vmul.f32 %v600_v7, %v600_v7 }
 0x1b5   : > { %v590_v10 = vpop.f32.mrf.mxu1 }
 0x1b6   : > { %v601_v11 = vmul.f32 %v599_v5, %v590_v10 }
 0x1b8   : > { %v603_v13 = vsub.f32 %v601_v11, %v602_v9 }
 0x1ba   : > { %v604_v14 = vmax.f32 %v603_v13, 0.0 }
 0x1bc   : > { %v605_v15 = vadd.f32 1e-05, %v604_v14 }
 0x1be   : > { %930 = vrsqrt.f32 %v605_v15  ;;  %vm612_vm10 = vweird.f32 %v605_v15 }
 0x1c4   : > { %v931_v16 = vpop.eup %930 }
 0x1c5   : > { %v607_v17 = vmul.f32 %v931_v16, %v605_v15  ;;  %vm613_vm9 = vweird.f32 %v931_v16 }
 0x1c6   : > { %vm614_vm11 = vmor %vm612_vm10, %vm613_vm9 }
 0x1c7   : > { %v608_v18 = vmul.f32 %v931_v16, %v607_v17 }
 0x1c9   : > { %v609_v19 = vmul.f32 0.5, %v608_v18 }
 0x1cb   : > { %v610_v20 = vsub.f32 1.5, %v609_v19 }
 0x1cd   : > { %v611_v21 = vmul.f32 %v931_v16, %v610_v20 }
 0x1cf   : > { %v615_v22 = vsel %vm614_vm11, %v931_v16, %v611_v21 }
 0x1d0   : > { %627 = vperm.xlu1 %925, %v615_v22  }
 0x222   : > { %v619_v25 = vpop.permute.xlu1 %618 }
 0x223   : > { %v621_v27 = vsub.f32 %v1056_v29, %v619_v25  ;;  %v622_v28 = vsub.f32 %v1058_v30, %v619_v25  ;;  %v623_v31 = vsub.f32 %v1068_v41, %v619_v25  ;;  %v624_v32 = vsub.f32 %v1072_v44, %v619_v25  ;;  %v661_v41 = vld.sshfl [vmem:[#allocation1] sm:$0xff pattern:$0x75316420] }
 0x242   : > { %v628_v33 = vpop.permute.xlu1 %627 }
 0x243   : > { %v630_v34 = vmul.f32 %v628_v33, %v621_v27  ;;  %v631_v35 = vmul.f32 %v628_v33, %v622_v28  ;;  %v632_v36 = vmul.f32 %v628_v33, %v623_v31  ;;  %v633_v37 = vmul.f32 %v628_v33, %v624_v32 }
 0x245   : > { %v640_v38 = vmul.f32 %v638_v26, %v630_v34  ;;  %v641_v39 = vmul.f32 %v638_v26, %v631_v35  ;;  %v642_v40 = vmul.f32 %v638_v26, %v632_v36  ;;  %v643_v42 = vmul.f32 %v638_v26, %v633_v37 }
 0x247   : > { %v650_v29 = vadd.f32 %v648_v43, %v640_v38  ;;  %v651_v47 = vadd.f32 %v648_v43, %v641_v39  ;;  %v652_v30 = vadd.f32 %v648_v43, %v642_v40  ;;  %v653_v48 = vadd.f32 %v648_v43, %v643_v42 }
 0x249   : > { %v670_v44 = vadd.f32 %v662_v45, %v651_v47  ;;  %v672_v50 = vadd.f32 %v664_v46, %v653_v48  ;;  %v669_v51 = vadd.f32 %v661_v41, %v650_v29  ;;  %v671_v52 = vadd.f32 %v663_v49, %v652_v30 }
 0x24b   : > { %v677_v53 = vrot.slane %v670_v44, 4  ;;  %v678_v54 = vrot.slane %v672_v50, 4 }
 0x24d   : > { %v679_v55 = vsel %vm519_vm4, %v669_v51, %v677_v53  ;;  %v680_v56 = vsel %vm519_vm4, %v671_v52, %v678_v54 }
 0x24e   : > { %683 = vst [vmem:[%s271_s17] sm:$0xff] %v679_v55 }
 0x24f   : > { %684 = vst [vmem:[%s271_s17 + $0x8] sm:$0xff] %v680_v56 }
 0x250 PF: > { %s16_s21 = sadd.s32 1, %s938_s21  }
 0x251   : > { %p13_p4 = scmp.ge.s32.totalorder %s16_s21, 4  }
 0x253   :  { %15 = sbr.rel (!%p13_p4) target bundleno = 1 (0x1), region = 78 }

// kernel: decoder_forward.11
= control target key start
LH: loop header
LB: loop body
LE: loop exit
PB: predicated region body
PF: predicated region fallthrough
CT: control target
= control target key end

     0   :  { %s383_s12 = smov 0   ;;  %s419_s0 = inlined_call_operand.vmem [shape: bf16[2,8,512], index: 0, kind: input, shape index: {}]   ;;  %s420_s1 = inlined_call_operand.vmem [shape: bf16[4,8], index: 1, kind: input, shape index: {}]   ;;  %s421_s2 = inlined_call_operand.vmem [shape: f32[4,1], index: 2, kind: input, shape index: {}]   ;;  %s422_s3 = inlined_call_operand.vmem [shape: f32[2,4,512], index: 3, kind: output, shape index: {}]  }
   0x1 LB: > { %s327_s13 = sadd.s32 4294967295, %s360_s12   ;;  %p331_p0 = scmp.ge.s32.totalorder %s360_s12, 1  ;;  %s360_s12 = sphi %s383_s12, %s13_s12  }
   0x2   : > { %p137_p1 = scmp.lt.s32.totalorder %s360_s12, 3 }
   0x4   : > { %p138_p2 = pnand %p331_p0, %p137_p1 }
   0x5   : > { %p161_p3 = scmp.lt.s32.totalorder (!%p138_p2), %s327_s13, 1 }
   0x6   : > { %141 = sbr.rel (%p138_p2) target bundleno = 164 (0xa4), region = 32 }
   0xb   : > { %v362_v0 = vmov 0   ;;  %v175_v1 = vld [vmem:[%s421_s2] sm:$0xf]  ;;  %s424_s13 = smov (!%p161_p3, %s327_s13), 1  ;;  %vm195_vm0 = vcmask 1043456   ;;  %vm191_vm1 = vcmask 64512  }
   0xc   : > { %353 = vset.pattern.permute.xlu0 %v362_v0  ;;  %s342_s16 = sshll.u32 %s424_s13, 4  ;;  %v172_v16 = vld [vmem:[%s420_s1] sm:$0x3] }
   0xd   : > { %178 = vperm.xlu0 %353, %v175_v1   ;;  %s165_s19 = scalar_lea.vmem %s419_s0, %s342_s16  ;;  %s170_s24 = scalar_lea.vmem %s422_s3, %s342_s16 }
   0xe   : > { %v173_v2 = vld [vmem:[%s165_s19] sm:$0xff]  ;;  %v174_v3 = vld [vmem:[%s165_s19 + $0x8] sm:$0xff] }
   0xf   : > { %v183_v4 = vunpack.c.l.b16 %v173_v2  ;;  %v184_v5 = vunpack.c.h.b16 %v173_v2  ;;  %v185_v6 = vunpack.c.l.b16 %v174_v3  ;;  %v186_v7 = vunpack.c.h.b16 %v174_v3 }
  0x11   : > { %v187_v8 = vpack.c.b16 %v183_v4, %v183_v4  ;;  %v188_v9 = vpack.c.b16 %v184_v5, %v184_v5  ;;  %v189_v10 = vpack.c.b16 %v185_v6, %v185_v6  ;;  %v190_v11 = vpack.c.b16 %v186_v7, %v186_v7 }
  0x13   : > { %v197_v12 = vsel %vm195_vm0, %v187_v8, 0  ;;  %v200_v13 = vsel %vm195_vm0, %v188_v9, 0  ;;  %v203_v14 = vsel %vm195_vm0, %v189_v10, 0  ;;  %v206_v15 = vsel %vm195_vm0, %v190_v11, 0 }
  0x14   : > { %215 = vmatpush.bf16.msra.mxu0 %v197_v12  ;;  %228 = vmatpush.bf16.msra.mxu1 %v200_v13 }
  0x15   : > { %241 = vmatpush.bf16.msra.mxu2 %v203_v14  ;;  %254 = vmatpush.bf16.msra.mxu3 %v206_v15 }
  0x17   : > { %336 = vmatmul.msk.bf16.vlgmr.msra.gmra.mxu0 %vm191_vm1, %v172_v16  ;;  %337 = vmatmul.msk.bf16.vlgmr.msra.gmra.mxu1 %vm191_vm1, %v172_v16 }
  0x18   : > { %338 = vmatmul.msk.bf16.vlgmr.msra.gmra.mxu2 %vm191_vm1, %v172_v16  ;;  %339 = vmatmul.msk.bf16.vlgmr.msra.gmra.mxu3 %vm191_vm1, %v172_v16 }
  0x7f   : > { %v179_v17 = vpop.permute.xlu0 %178 }
  0x94   : > { %v217_v18 = vpop.f32.mrf.mxu0  ;;  %v230_v19 = vpop.f32.mrf.mxu1 }
  0x95   : > { %v218_v20 = vadd.f32 %v217_v18, %v179_v17  ;;  %v231_v21 = vadd.f32 %v230_v19, %v179_v17 }
  0x97   : > { %v264_v22 = vrot.slane %v231_v21, 4 }
  0x99   : > { %v266_v23 = vsel %vm195_vm0, %v218_v20, %v264_v22 }
  0x9a   : > { %270 = vst [vmem:[%s170_s24] sm:$0xff] %v266_v23 }
  0x9b   : > { %v243_v24 = vpop.f32.mrf.mxu2  ;;  %v256_v25 = vpop.f32.mrf.mxu3 }
  0x9c   : > { %v257_v26 = vadd.f32 %v256_v25, %v179_v17  ;;  %v219_v27 = vpop.f32.mrf.mxu0  ;;  %v232_v28 = vpop.f32.mrf.mxu1  ;;  %v244_v29 = vadd.f32 %v243_v24, %v179_v17 }
  0x9e   : > { %v265_v30 = vrot.slane %v257_v26, 4 }
  0xa0   : > { %v267_v31 = vsel %vm195_vm0, %v244_v29, %v265_v30 }
  0xa1   : > { %271 = vst [vmem:[%s170_s24 + $0x8] sm:$0xff] %v267_v31 }
  0xa3   : > { %v245_v32 = vpop.f32.mrf.mxu2  ;;  %v258_v33 = vpop.f32.mrf.mxu3 }
  0xa4 PF: > { %s13_s12 = sadd.s32 1, %s360_s12  }
  0xa5   : > { %p10_p4 = scmp.ge.s32.totalorder %s13_s12, 4  }
  0xa7   :  { %12 = sbr.rel (!%p10_p4) target bundleno = 1 (0x1), region = 62 }

// kernel: decoder_forward.13
= control target key start
LH: loop header
LB: loop body
LE: loop exit
PB: predicated region body
PF: predicated region fallthrough
CT: control target
= control target key end

     0   :  { %s489_s9 = smov 0   ;;  %s550_s0 = inlined_call_operand.vmem [shape: f32[8,8,256], index: 0, kind: input, shape index: {}]   ;;  %s551_s1 = inlined_call_operand.vmem [shape: f32[16,8], index: 1, kind: input, shape index: {}]   ;;  %s552_s2 = inlined_call_operand.vmem [shape: f32[8,16,256], index: 2, kind: output, shape index: {}]  }
   0x1 LB: > { %s427_s10 = sadd.s32 4294967295, %s472_s9   ;;  %p431_p0 = scmp.ge.s32.totalorder %s472_s9, 1  ;;  %s472_s9 = sphi %s489_s9, %s12_s9  }
   0x2   : > { %p114_p1 = scmp.lt.s32.totalorder %s472_s9, 3 }
   0x4   : > { %p115_p2 = pnand %p431_p0, %p114_p1 }
   0x5   : > { %s432_s11 = sshll.u32 (!%p115_p2), %s427_s10, 2 }
   0x6   : > { %118 = sbr.rel (%p115_p2) target bundleno = 174 (0xae), region = 28  ;;  %p139_p3 = scmp.lt.s32.totalorder (!%p115_p2), %s432_s11, 7 }
   0xb   : > { %s554_s11 = smov (!%p139_p3, %s432_s11), 7  ;;  %v160_v0 = vld [vmem:[%s551_s1] sm:$0xff]  ;;  %vm162_vm0 = vcmask 64512   ;;  %v161_v9 = vld [vmem:[%s551_s1 + $0x8] sm:$0xff] }
   0xc   : > { %s456_s12 = sshll.u32 %s554_s11, 4  ;;  %s457_s20 = sshll.u32 %s554_s11, 5 }
   0xd   : > { %s143_s15 = scalar_lea.vmem %s550_s0, %s456_s12  ;;  %s529_s23 = scalar_lea.vmem %s552_s2, %s457_s20 }
   0xe   : > { %v154_v1 = vld [vmem:[%s143_s15 + $0x10] sm:$0xff]  ;;  %v155_v2 = vld [vmem:[%s143_s15 + $0x18] sm:$0xff]  ;;  %v152_v5 = vld [vmem:[%s143_s15] sm:$0xff] }
   0xf   : > { %v158_v3 = vld [vmem:[%s143_s15 + $0x30] sm:$0xff]  ;;  %230 = vmatpush.msra.mxu2 %v154_v1  ;;  %253 = vmatpush.msra.mxu3 %v155_v2  ;;  %v159_v4 = vld [vmem:[%s143_s15 + $0x38] sm:$0xff]  ;;  %v153_v6 = vld [vmem:[%s143_s15 + $0x8] sm:$0xff] }
  0x10   : > { %442 = vmatmul.msk.f32.vlgmr.msra.gmra.mxu2 %vm162_vm0, %v160_v0  ;;  %444 = vmatmul.msk.f32.vlgmr.msra.gmra.mxu3 %vm162_vm0, %v160_v0  ;;  %v156_v7 = vld [vmem:[%s143_s15 + $0x20] sm:$0xff]  ;;  %v157_v8 = vld [vmem:[%s143_s15 + $0x28] sm:$0xff] }
  0x11   : > { %322 = vmatpush.msrb.mxu2 %v158_v3  ;;  %345 = vmatpush.msrb.mxu3 %v159_v4 }
  0x12   : > { %184 = vmatpush.msra.mxu0 %v152_v5  ;;  %207 = vmatpush.msra.mxu1 %v153_v6 }
  0x13   : > { %438 = vmatmul.msk.f32.vlgmr.msra.gmra.mxu0 %vm162_vm0, %v160_v0  ;;  %440 = vmatmul.msk.f32.vlgmr.msra.gmra.mxu1 %vm162_vm0, %v160_v0 }
  0x14   : > { %276 = vmatpush.msrb.mxu0 %v156_v7  ;;  %299 = vmatpush.msrb.mxu1 %v157_v8 }
  0x18   : > { %443 = vmatmul.msk.f32.gmra.mxu2 %vm162_vm0, %v161_v9  ;;  %445 = vmatmul.msk.f32.gmra.mxu3 %vm162_vm0, %v161_v9 }
  0x1b   : > { %439 = vmatmul.msk.f32.gmra.mxu0 %vm162_vm0, %v161_v9  ;;  %441 = vmatmul.msk.f32.gmra.mxu1 %vm162_vm0, %v161_v9 }
  0x20   : > { %450 = vmatmul.msk.f32.vlgmr.msrb.gmra.mxu2 %vm162_vm0, %v160_v0  ;;  %452 = vmatmul.msk.f32.vlgmr.msrb.gmra.mxu3 %vm162_vm0, %v160_v0 }
  0x23   : > { %446 = vmatmul.msk.f32.vlgmr.msrb.gmra.mxu0 %vm162_vm0, %v160_v0  ;;  %448 = vmatmul.msk.f32.vlgmr.msrb.gmra.mxu1 %vm162_vm0, %v160_v0 }
  0x28   : > { %451 = vmatmul.msk.f32.gmra.mxu2 %vm162_vm0, %v161_v9  ;;  %453 = vmatmul.msk.f32.gmra.mxu3 %vm162_vm0, %v161_v9 }
  0x2b   : > { %447 = vmatmul.msk.f32.gmra.mxu0 %vm162_vm0, %v161_v9  ;;  %449 = vmatmul.msk.f32.gmra.mxu1 %vm162_vm0, %v161_v9 }
  0x90   : > { %v186_v10 = vpop.f32.mrf.mxu0  ;;  %v209_v11 = vpop.f32.mrf.mxu1 }
  0x91   : > { %353 = vst [vmem:[%s529_s23] sm:$0xff] %v186_v10 }
  0x92   : > { %354 = vst [vmem:[%s529_s23 + $0x8] sm:$0xff] %v209_v11 }
  0x93   : > { %v232_v12 = vpop.f32.mrf.mxu2  ;;  %v255_v13 = vpop.f32.mrf.mxu3 }
  0x94   : > { %357 = vst [vmem:[%s529_s23 + $0x20] sm:$0xff] %v232_v12 }
  0x95   : > { %358 = vst [vmem:[%s529_s23 + $0x28] sm:$0xff] %v255_v13 }
  0x98   : > { %v189_v14 = vpop.f32.mrf.mxu0  ;;  %v212_v15 = vpop.f32.mrf.mxu1 }
  0x99   : > { %355 = vst [vmem:[%s529_s23 + $0x10] sm:$0xff] %v189_v14 }
  0x9a   : > { %356 = vst [vmem:[%s529_s23 + $0x18] sm:$0xff] %v212_v15 }
  0x9b   : > { %v235_v16 = vpop.f32.mrf.mxu2  ;;  %v258_v17 = vpop.f32.mrf.mxu3 }
  0x9c   : > { %359 = vst [vmem:[%s529_s23 + $0x30] sm:$0xff] %v235_v16 }
  0x9d   : > { %360 = vst [vmem:[%s529_s23 + $0x38] sm:$0xff] %v258_v17 }
  0xa0   : > { %v278_v18 = vpop.f32.mrf.mxu0  ;;  %v301_v19 = vpop.f32.mrf.mxu1 }
  0xa1   : > { %361 = vst [vmem:[%s529_s23 + $0x40] sm:$0xff] %v278_v18 }
  0xa2   : > { %362 = vst [vmem:[%s529_s23 + $0x48] sm:$0xff] %v301_v19 }
  0xa3   : > { %v324_v20 = vpop.f32.mrf.mxu2  ;;  %v347_v21 = vpop.f32.mrf.mxu3 }
  0xa4   : > { %365 = vst [vmem:[%s529_s23 + $0x60] sm:$0xff] %v324_v20 }
  0xa5   : > { %366 = vst [vmem:[%s529_s23 + $0x68] sm:$0xff] %v347_v21 }
  0xa8   : > { %v281_v22 = vpop.f32.mrf.mxu0  ;;  %v304_v23 = vpop.f32.mrf.mxu1 }
  0xa9   : > { %363 = vst [vmem:[%s529_s23 + $0x50] sm:$0xff] %v281_v22 }
  0xaa   : > { %364 = vst [vmem:[%s529_s23 + $0x58] sm:$0xff] %v304_v23 }
  0xab   : > { %v327_v24 = vpop.f32.mrf.mxu2  ;;  %v350_v25 = vpop.f32.mrf.mxu3 }
  0xac   : > { %367 = vst [vmem:[%s529_s23 + $0x70] sm:$0xff] %v327_v24 }
  0xad   : > { %368 = vst [vmem:[%s529_s23 + $0x78] sm:$0xff] %v350_v25 }
  0xae PF: > { %s12_s9 = sadd.s32 1, %s472_s9  }
  0xaf   : > { %p9_p4 = scmp.ge.s32.totalorder %s12_s9, 4  }
  0xb1   :  { %11 = sbr.rel (!%p9_p4) target bundleno = 1 (0x1), region = 58 }

// kernel: decoder_forward.12
= control target key start
LH: loop header
LB: loop body
LE: loop exit
PB: predicated region body
PF: predicated region fallthrough
CT: control target
= control target key end

     0   :  { %s2182_s12 = smov 0   ;;  %s2606_s0 = inlined_call_operand.vmem [shape: f32[64,8,8], index: 0, kind: input, shape index: {}]   ;;  %s2607_s1 = inlined_call_operand.vmem [shape: f32[16,8], index: 1, kind: input, shape index: {}]   ;;  %s2608_s2 = inlined_call_operand.vmem [shape: f32[8,16], index: 2, kind: input, shape index: {}]   ;;  %s2609_s3 = inlined_call_operand.vmem [shape: f32[64,16,16], index: 3, kind: output, shape index: {}]  }
   0x1 LB: > { %s2005_s13 = sadd.s32 4294967295, %s2160_s12   ;;  %p2009_p0 = scmp.ge.s32.totalorder %s2160_s12, 1  ;;  %s2160_s12 = sphi %s2182_s12, %s13_s12  }
   0x2   : > { %p138_p1 = scmp.lt.s32.totalorder %s2160_s12, 3 }
   0x4   : > { %p139_p2 = pnand %p2009_p0, %p138_p1 }
   0x5   : > { %s2010_s14 = sshll.u32 (!%p139_p2), %s2005_s13, 5 }
   0x6   : > { %142 = sbr.rel (%p139_p2) target bundleno = 402 (0x192), region = 32  ;;  %p164_p3 = scmp.lt.s32.totalorder (!%p139_p2), %s2010_s14, 63 }
   0xb   : > { %s2611_s14 = smov (!%p164_p3, %s2010_s14), 63  ;;  %v2201_v0 = vld [vmem:[%s2607_s1] sm:$0xff]  ;;  %vm210_vm0 = vcmask 64512   ;;  %v2226_v13 = vld [vmem:[%s2607_s1 + $0x8] sm:$0xff]  ;;  %vm1882_vm1 = vcmask 130048  }
   0xc   : > { %s2011_s15 = sshll.u32 %s2611_s14, 3  ;;  %v2339_v34 = vld [vmem:[%s2608_s2] sm:$0xff]  ;;  %s2145_s25 = sshll.u32 %s2611_s14, 4 }
   0xd   : > { %s2196_s18 = scalar_lea.vmem %s2606_s0, %s2011_s15  ;;  %s2473_s28 = scalar_lea.vmem %s2609_s3, %s2145_s25 }
   0xe   : > { %v178_v1 = vld [vmem:[%s2196_s18 + $0x10] sm:$0xff]  ;;  %v179_v2 = vld [vmem:[%s2196_s18 + $0x18] sm:$0xff]  ;;  %v176_v5 = vld [vmem:[%s2196_s18] sm:$0xff] }
   0xf   : > { %v182_v3 = vld [vmem:[%s2196_s18 + $0x30] sm:$0xff]  ;;  %278 = vmatpush.msra.mxu2 %v178_v1  ;;  %301 = vmatpush.msra.mxu3 %v179_v2  ;;  %v183_v4 = vld [vmem:[%s2196_s18 + $0x38] sm:$0xff]  ;;  %v177_v6 = vld [vmem:[%s2196_s18 + $0x8] sm:$0xff] }
  0x10   : > { %2019 = vmatmul.msk.f32.vlgmr.msra.gmra.mxu2 %vm210_vm0, %v2201_v0  ;;  %2021 = vmatmul.msk.f32.vlgmr.msra.gmra.mxu3 %vm210_vm0, %v2201_v0  ;;  %v180_v7 = vld [vmem:[%s2196_s18 + $0x20] sm:$0xff]  ;;  %v181_v8 = vld [vmem:[%s2196_s18 + $0x28] sm:$0xff]  ;;  %v186_v9 = vld [vmem:[%s2196_s18 + $0x50] sm:$0xff] }
  0x11   : > { %370 = vmatpush.msrb.mxu2 %v182_v3  ;;  %393 = vmatpush.msrb.mxu3 %v183_v4  ;;  %v187_v10 = vld [vmem:[%s2196_s18 + $0x58] sm:$0xff]  ;;  %v184_v11 = vld [vmem:[%s2196_s18 + $0x40] sm:$0xff]  ;;  %v185_v12 = vld [vmem:[%s2196_s18 + $0x48] sm:$0xff] }
  0x12   : > { %232 = vmatpush.msra.mxu0 %v176_v5  ;;  %255 = vmatpush.msra.mxu1 %v177_v6  ;;  %v190_v14 = vld [vmem:[%s2196_s18 + $0x70] sm:$0xff]  ;;  %v191_v15 = vld [vmem:[%s2196_s18 + $0x78] sm:$0xff]  ;;  %v188_v16 = vld [vmem:[%s2196_s18 + $0x60] sm:$0xff] }
  0x13   : > { %2015 = vmatmul.msk.f32.vlgmr.msra.gmra.mxu0 %vm210_vm0, %v2201_v0  ;;  %2017 = vmatmul.msk.f32.vlgmr.msra.gmra.mxu1 %vm210_vm0, %v2201_v0  ;;  %v189_v17 = vld [vmem:[%s2196_s18 + $0x68] sm:$0xff]  ;;  %v194_v18 = vld [vmem:[%s2196_s18 + $0x90] sm:$0xff]  ;;  %v195_v19 = vld [vmem:[%s2196_s18 + $0x98] sm:$0xff] }
  0x14   : > { %324 = vmatpush.msrb.mxu0 %v180_v7  ;;  %347 = vmatpush.msrb.mxu1 %v181_v8  ;;  %v192_v20 = vld [vmem:[%s2196_s18 + $0x80] sm:$0xff]  ;;  %v193_v21 = vld [vmem:[%s2196_s18 + $0x88] sm:$0xff]  ;;  %v198_v22 = vld [vmem:[%s2196_s18 + $0xb0] sm:$0xff] }
  0x15   : > { %462 = vmatpush.msra.mxu2 %v186_v9  ;;  %485 = vmatpush.msra.mxu3 %v187_v10  ;;  %v199_v23 = vld [vmem:[%s2196_s18 + $0xb8] sm:$0xff]  ;;  %v196_v24 = vld [vmem:[%s2196_s18 + $0xa0] sm:$0xff]  ;;  %v197_v25 = vld [vmem:[%s2196_s18 + $0xa8] sm:$0xff] }
  0x16   : > { %416 = vmatpush.msra.mxu0 %v184_v11  ;;  %439 = vmatpush.msra.mxu1 %v185_v12  ;;  %v202_v26 = vld [vmem:[%s2196_s18 + $0xd0] sm:$0xff]  ;;  %v203_v27 = vld [vmem:[%s2196_s18 + $0xd8] sm:$0xff]  ;;  %v200_v28 = vld [vmem:[%s2196_s18 + $0xc0] sm:$0xff] }
  0x17   : > { %v201_v29 = vld [vmem:[%s2196_s18 + $0xc8] sm:$0xff]  ;;  %v206_v30 = vld [vmem:[%s2196_s18 + $0xf0] sm:$0xff]  ;;  %v207_v31 = vld [vmem:[%s2196_s18 + $0xf8] sm:$0xff] }
  0x18   : > { %2020 = vmatmul.msk.f32.gmra.mxu2 %vm210_vm0, %v2226_v13  ;;  %2022 = vmatmul.msk.f32.gmra.mxu3 %vm210_vm0, %v2226_v13  ;;  %v204_v32 = vld [vmem:[%s2196_s18 + $0xe0] sm:$0xff]  ;;  %v205_v33 = vld [vmem:[%s2196_s18 + $0xe8] sm:$0xff] }
  0x1b   : > { %2016 = vmatmul.msk.f32.gmra.mxu0 %vm210_vm0, %v2226_v13  ;;  %2018 = vmatmul.msk.f32.gmra.mxu1 %vm210_vm0, %v2226_v13 }
  0x20   : > { %2027 = vmatmul.msk.f32.vlgmr.msrb.gmra.mxu2 %vm210_vm0, %v2201_v0  ;;  %2029 = vmatmul.msk.f32.vlgmr.msrb.gmra.mxu3 %vm210_vm0, %v2201_v0 }
  0x21   : > { %554 = vmatpush.msrb.mxu2 %v190_v14  ;;  %577 = vmatpush.msrb.mxu3 %v191_v15 }
  0x23   : > { %2023 = vmatmul.msk.f32.vlgmr.msrb.gmra.mxu0 %vm210_vm0, %v2201_v0  ;;  %2025 = vmatmul.msk.f32.vlgmr.msrb.gmra.mxu1 %vm210_vm0, %v2201_v0 }
  0x24   : > { %508 = vmatpush.msrb.mxu0 %v188_v16  ;;  %531 = vmatpush.msrb.mxu1 %v189_v17 }
  0x28   : > { %2028 = vmatmul.msk.f32.gmra.mxu2 %vm210_vm0, %v2226_v13  ;;  %2030 = vmatmul.msk.f32.gmra.mxu3 %vm210_vm0, %v2226_v13 }
  0x2b   : > { %2024 = vmatmul.msk.f32.gmra.mxu0 %vm210_vm0, %v2226_v13  ;;  %2026 = vmatmul.msk.f32.gmra.mxu1 %vm210_vm0, %v2226_v13 }
  0x30   : > { %2035 = vmatmul.msk.f32.vlgmr.msra.gmra.mxu2 %vm210_vm0, %v2201_v0  ;;  %2037 = vmatmul.msk.f32.vlgmr.msra.gmra.mxu3 %vm210_vm0, %v2201_v0 }
  0x31   : > { %646 = vmatpush.msra.mxu2 %v194_v18  ;;  %669 = vmatpush.msra.mxu3 %v195_v19 }
  0x33   : > { %2031 = vmatmul.msk.f32.vlgmr.msra.gmra.mxu0 %vm210_vm0, %v2201_v0  ;;  %2033 = vmatmul.msk.f32.vlgmr.msra.gmra.mxu1 %vm210_vm0, %v2201_v0 }
  0x34   : > { %600 = vmatpush.msra.mxu0 %v192_v20  ;;  %623 = vmatpush.msra.mxu1 %v193_v21 }
  0x38   : > { %2036 = vmatmul.msk.f32.gmra.mxu2 %vm210_vm0, %v2226_v13  ;;  %2038 = vmatmul.msk.f32.gmra.mxu3 %vm210_vm0, %v2226_v13 }
  0x3b   : > { %2032 = vmatmul.msk.f32.gmra.mxu0 %vm210_vm0, %v2226_v13  ;;  %2034 = vmatmul.msk.f32.gmra.mxu1 %vm210_vm0, %v2226_v13 }
  0x40   : > { %2043 = vmatmul.msk.f32.vlgmr.msrb.gmra.mxu2 %vm210_vm0, %v2201_v0  ;;  %2045 = vmatmul.msk.f32.vlgmr.msrb.gmra.mxu3 %vm210_vm0, %v2201_v0 }
  0x41   : > { %738 = vmatpush.msrb.mxu2 %v198_v22  ;;  %761 = vmatpush.msrb.mxu3 %v199_v23 }
  0x43   : > { %2039 = vmatmul.msk.f32.vlgmr.msrb.gmra.mxu0 %vm210_vm0, %v2201_v0  ;;  %2041 = vmatmul.msk.f32.vlgmr.msrb.gmra.mxu1 %vm210_vm0, %v2201_v0 }
  0x44   : > { %692 = vmatpush.msrb.mxu0 %v196_v24  ;;  %715 = vmatpush.msrb.mxu1 %v197_v25 }
  0x48   : > { %2044 = vmatmul.msk.f32.gmra.mxu2 %vm210_vm0, %v2226_v13  ;;  %2046 = vmatmul.msk.f32.gmra.mxu3 %vm210_vm0, %v2226_v13 }
  0x4b   : > { %2040 = vmatmul.msk.f32.gmra.mxu0 %vm210_vm0, %v2226_v13  ;;  %2042 = vmatmul.msk.f32.gmra.mxu1 %vm210_vm0, %v2226_v13 }
  0x50   : > { %2051 = vmatmul.msk.f32.vlgmr.msra.gmra.mxu2 %vm210_vm0, %v2201_v0  ;;  %2053 = vmatmul.msk.f32.vlgmr.msra.gmra.mxu3 %vm210_vm0, %v2201_v0 }
  0x51   : > { %830 = vmatpush.msra.mxu2 %v202_v26  ;;  %853 = vmatpush.msra.mxu3 %v203_v27 }
  0x53   : > { %2047 = vmatmul.msk.f32.vlgmr.msra.gmra.mxu0 %vm210_vm0, %v2201_v0  ;;  %2049 = vmatmul.msk.f32.vlgmr.msra.gmra.mxu1 %vm210_vm0, %v2201_v0 }
  0x54   : > { %784 = vmatpush.msra.mxu0 %v200_v28  ;;  %807 = vmatpush.msra.mxu1 %v201_v29 }
  0x58   : > { %2052 = vmatmul.msk.f32.gmra.mxu2 %vm210_vm0, %v2226_v13  ;;  %2054 = vmatmul.msk.f32.gmra.mxu3 %vm210_vm0, %v2226_v13 }
  0x5b   : > { %2048 = vmatmul.msk.f32.gmra.mxu0 %vm210_vm0, %v2226_v13  ;;  %2050 = vmatmul.msk.f32.gmra.mxu1 %vm210_vm0, %v2226_v13 }
  0x60   : > { %2059 = vmatmul.msk.f32.vlgmr.msrb.gmra.mxu2 %vm210_vm0, %v2201_v0  ;;  %2061 = vmatmul.msk.f32.vlgmr.msrb.gmra.mxu3 %vm210_vm0, %v2201_v0 }
  0x61   : > { %922 = vmatpush.msrb.mxu2 %v206_v30  ;;  %945 = vmatpush.msrb.mxu3 %v207_v31 }
  0x63   : > { %2055 = vmatmul.msk.f32.vlgmr.msrb.gmra.mxu0 %vm210_vm0, %v2201_v0  ;;  %2057 = vmatmul.msk.f32.vlgmr.msrb.gmra.mxu1 %vm210_vm0, %v2201_v0 }
  0x64   : > { %876 = vmatpush.msrb.mxu0 %v204_v32  ;;  %899 = vmatpush.msrb.mxu1 %v205_v33 }
  0x68   : > { %2060 = vmatmul.msk.f32.gmra.mxu2 %vm210_vm0, %v2226_v13  ;;  %2062 = vmatmul.msk.f32.gmra.mxu3 %vm210_vm0, %v2226_v13 }
  0x6b   : > { %2056 = vmatmul.msk.f32.gmra.mxu0 %vm210_vm0, %v2226_v13  ;;  %2058 = vmatmul.msk.f32.gmra.mxu1 %vm210_vm0, %v2226_v13 }
  0x70   : > { %2067 = vmatmul.msk.f32.vlgmr.msra.gmra.mxu2 %vm210_vm0, %v2201_v0  ;;  %2069 = vmatmul.msk.f32.vlgmr.msra.gmra.mxu3 %vm210_vm0, %v2201_v0 }
  0x71   : > { %1033 = vmatpush.msra.mxu2 %v2339_v34  ;;  %1062 = vmatpush.msra.mxu3 %v2339_v34 }
  0x73   : > { %2063 = vmatmul.msk.f32.vlgmr.msra.gmra.mxu0 %vm210_vm0, %v2201_v0  ;;  %2065 = vmatmul.msk.f32.vlgmr.msra.gmra.mxu1 %vm210_vm0, %v2201_v0 }
  0x74   : > { %975 = vmatpush.msra.mxu0 %v2339_v34  ;;  %1004 = vmatpush.msra.mxu1 %v2339_v34 }
  0x78   : > { %2068 = vmatmul.msk.f32.gmra.mxu2 %vm210_vm0, %v2226_v13  ;;  %2070 = vmatmul.msk.f32.gmra.mxu3 %vm210_vm0, %v2226_v13 }
  0x7b   : > { %2064 = vmatmul.msk.f32.gmra.mxu0 %vm210_vm0, %v2226_v13  ;;  %2066 = vmatmul.msk.f32.gmra.mxu1 %vm210_vm0, %v2226_v13 }
  0x80   : > { %2075 = vmatmul.msk.f32.vlgmr.msrb.gmra.mxu2 %vm210_vm0, %v2201_v0  ;;  %2077 = vmatmul.msk.f32.vlgmr.msrb.gmra.mxu3 %vm210_vm0, %v2201_v0 }
  0x81   : > { %1149 = vmatpush.msrb.mxu2 %v2339_v34  ;;  %1178 = vmatpush.msrb.mxu3 %v2339_v34 }
  0x83   : > { %2071 = vmatmul.msk.f32.vlgmr.msrb.gmra.mxu0 %vm210_vm0, %v2201_v0  ;;  %2073 = vmatmul.msk.f32.vlgmr.msrb.gmra.mxu1 %vm210_vm0, %v2201_v0 }
  0x84   : > { %1091 = vmatpush.msrb.mxu0 %v2339_v34  ;;  %1120 = vmatpush.msrb.mxu1 %v2339_v34 }
  0x88   : > { %2076 = vmatmul.msk.f32.gmra.mxu2 %vm210_vm0, %v2226_v13  ;;  %2078 = vmatmul.msk.f32.gmra.mxu3 %vm210_vm0, %v2226_v13 }
  0x8b   : > { %2072 = vmatmul.msk.f32.gmra.mxu0 %vm210_vm0, %v2226_v13  ;;  %2074 = vmatmul.msk.f32.gmra.mxu1 %vm210_vm0, %v2226_v13 }
  0x90   : > { %v234_v35 = vpop.f32.mrf.mxu0  ;;  %v257_v36 = vpop.f32.mrf.mxu1 }
  0x93   : > { %v280_v37 = vpop.f32.mrf.mxu2  ;;  %v303_v38 = vpop.f32.mrf.mxu3  ;;  %2079 = vmatmul.msk.f32.vlgmr.msra.gmra.mxu0 %vm210_vm0, %v234_v35  ;;  %2081 = vmatmul.msk.f32.vlgmr.msra.gmra.mxu1 %vm210_vm0, %v257_v36 }
  0x94   : > { %2083 = vmatmul.msk.f32.vlgmr.msra.gmra.mxu2 %vm210_vm0, %v280_v37  ;;  %2085 = vmatmul.msk.f32.vlgmr.msra.gmra.mxu3 %vm210_vm0, %v303_v38 }
  0x95   : > { %1265 = vmatpush.msra.mxu2 %v2339_v34  ;;  %1294 = vmatpush.msra.mxu3 %v2339_v34 }
  0x96   : > { %1207 = vmatpush.msra.mxu0 %v2339_v34  ;;  %1236 = vmatpush.msra.mxu1 %v2339_v34 }
  0x98   : > { %v237_v39 = vpop.f32.mrf.mxu0  ;;  %v260_v40 = vpop.f32.mrf.mxu1 }
  0x9b   : > { %v283_v41 = vpop.f32.mrf.mxu2  ;;  %v306_v42 = vpop.f32.mrf.mxu3  ;;  %2080 = vmatmul.msk.f32.gmra.mxu0 %vm210_vm0, %v237_v39  ;;  %2082 = vmatmul.msk.f32.gmra.mxu1 %vm210_vm0, %v260_v40 }
  0x9c   : > { %2084 = vmatmul.msk.f32.gmra.mxu2 %vm210_vm0, %v283_v41  ;;  %2086 = vmatmul.msk.f32.gmra.mxu3 %vm210_vm0, %v306_v42 }
  0xa0   : > { %v326_v43 = vpop.f32.mrf.mxu0  ;;  %v349_v44 = vpop.f32.mrf.mxu1 }
  0xa3   : > { %v372_v45 = vpop.f32.mrf.mxu2  ;;  %v395_v46 = vpop.f32.mrf.mxu3  ;;  %2087 = vmatmul.msk.f32.vlgmr.msrb.gmra.mxu0 %vm210_vm0, %v326_v43  ;;  %2089 = vmatmul.msk.f32.vlgmr.msrb.gmra.mxu1 %vm210_vm0, %v349_v44 }
  0xa4   : > { %2091 = vmatmul.msk.f32.vlgmr.msrb.gmra.mxu2 %vm210_vm0, %v372_v45  ;;  %2093 = vmatmul.msk.f32.vlgmr.msrb.gmra.mxu3 %vm210_vm0, %v395_v46 }
  0xa5   : > { %1381 = vmatpush.msrb.mxu2 %v2339_v34  ;;  %1410 = vmatpush.msrb.mxu3 %v2339_v34 }
  0xa6   : > { %1323 = vmatpush.msrb.mxu0 %v2339_v34  ;;  %1352 = vmatpush.msrb.mxu1 %v2339_v34 }
  0xa8   : > { %v329_v47 = vpop.f32.mrf.mxu0  ;;  %v352_v48 = vpop.f32.mrf.mxu1 }
  0xab   : > { %v375_v49 = vpop.f32.mrf.mxu2  ;;  %v398_v50 = vpop.f32.mrf.mxu3  ;;  %2088 = vmatmul.msk.f32.gmra.mxu0 %vm210_vm0, %v329_v47  ;;  %2090 = vmatmul.msk.f32.gmra.mxu1 %vm210_vm0, %v352_v48 }
  0xac   : > { %2092 = vmatmul.msk.f32.gmra.mxu2 %vm210_vm0, %v375_v49  ;;  %2094 = vmatmul.msk.f32.gmra.mxu3 %vm210_vm0, %v398_v50 }
  0xb0   : > { %v418_v51 = vpop.f32.mrf.mxu0  ;;  %v441_v52 = vpop.f32.mrf.mxu1 }
  0xb3   : > { %v464_v53 = vpop.f32.mrf.mxu2  ;;  %v487_v54 = vpop.f32.mrf.mxu3  ;;  %2095 = vmatmul.msk.f32.vlgmr.msra.gmra.mxu0 %vm210_vm0, %v418_v51  ;;  %2097 = vmatmul.msk.f32.vlgmr.msra.gmra.mxu1 %vm210_vm0, %v441_v52 }
  0xb4   : > { %2099 = vmatmul.msk.f32.vlgmr.msra.gmra.mxu2 %vm210_vm0, %v464_v53  ;;  %2101 = vmatmul.msk.f32.vlgmr.msra.gmra.mxu3 %vm210_vm0, %v487_v54 }
  0xb5   : > { %1497 = vmatpush.msra.mxu2 %v2339_v34  ;;  %1526 = vmatpush.msra.mxu3 %v2339_v34 }
  0xb6   : > { %1439 = vmatpush.msra.mxu0 %v2339_v34  ;;  %1468 = vmatpush.msra.mxu1 %v2339_v34 }
  0xb8   : > { %v421_v55 = vpop.f32.mrf.mxu0  ;;  %v444_v56 = vpop.f32.mrf.mxu1 }
  0xbb   : > { %v467_v57 = vpop.f32.mrf.mxu2  ;;  %v490_v58 = vpop.f32.mrf.mxu3  ;;  %2096 = vmatmul.msk.f32.gmra.mxu0 %vm210_vm0, %v421_v55  ;;  %2098 = vmatmul.msk.f32.gmra.mxu1 %vm210_vm0, %v444_v56 }
  0xbc   : > { %2100 = vmatmul.msk.f32.gmra.mxu2 %vm210_vm0, %v467_v57  ;;  %2102 = vmatmul.msk.f32.gmra.mxu3 %vm210_vm0, %v490_v58 }
  0xc0   : > { %v510_v59 = vpop.f32.mrf.mxu0  ;;  %v533_v60 = vpop.f32.mrf.mxu1 }
  0xc3   : > { %v556_v61 = vpop.f32.mrf.mxu2  ;;  %v579_v62 = vpop.f32.mrf.mxu3  ;;  %2103 = vmatmul.msk.f32.vlgmr.msrb.gmra.mxu0 %vm210_vm0, %v510_v59  ;;  %2105 = vmatmul.msk.f32.vlgmr.msrb.gmra.mxu1 %vm210_vm0, %v533_v60 }
  0xc4   : > { %2107 = vmatmul.msk.f32.vlgmr.msrb.gmra.mxu2 %vm210_vm0, %v556_v61  ;;  %2109 = vmatmul.msk.f32.vlgmr.msrb.gmra.mxu3 %vm210_vm0, %v579_v62 }
  0xc5   : > { %1613 = vmatpush.msrb.mxu2 %v2339_v34  ;;  %1642 = vmatpush.msrb.mxu3 %v2339_v34 }
  0xc6   : > { %1555 = vmatpush.msrb.mxu0 %v2339_v34  ;;  %1584 = vmatpush.msrb.mxu1 %v2339_v34 }
  0xc8   : > { %v513_v63 = vpop.f32.mrf.mxu0  ;;  %v536_v0 = vpop.f32.mrf.mxu1 }
  0xcb   : > { %v559_v1 = vpop.f32.mrf.mxu2  ;;  %v582_v2 = vpop.f32.mrf.mxu3  ;;  %2104 = vmatmul.msk.f32.gmra.mxu0 %vm210_vm0, %v513_v63  ;;  %2106 = vmatmul.msk.f32.gmra.mxu1 %vm210_vm0, %v536_v0 }
  0xcc   : > { %2108 = vmatmul.msk.f32.gmra.mxu2 %vm210_vm0, %v559_v1  ;;  %2110 = vmatmul.msk.f32.gmra.mxu3 %vm210_vm0, %v582_v2 }
  0xd0   : > { %v602_v3 = vpop.f32.mrf.mxu0  ;;  %v625_v4 = vpop.f32.mrf.mxu1 }
  0xd3   : > { %v648_v5 = vpop.f32.mrf.mxu2  ;;  %v671_v6 = vpop.f32.mrf.mxu3  ;;  %2111 = vmatmul.msk.f32.vlgmr.msra.gmra.mxu0 %vm210_vm0, %v602_v3  ;;  %2113 = vmatmul.msk.f32.vlgmr.msra.gmra.mxu1 %vm210_vm0, %v625_v4 }
  0xd4   : > { %2115 = vmatmul.msk.f32.vlgmr.msra.gmra.mxu2 %vm210_vm0, %v648_v5  ;;  %2117 = vmatmul.msk.f32.vlgmr.msra.gmra.mxu3 %vm210_vm0, %v671_v6 }
  0xd5   : > { %1729 = vmatpush.msra.mxu2 %v2339_v34  ;;  %1758 = vmatpush.msra.mxu3 %v2339_v34 }
  0xd6   : > { %1671 = vmatpush.msra.mxu0 %v2339_v34  ;;  %1700 = vmatpush.msra.mxu1 %v2339_v34 }
  0xd8   : > { %v605_v7 = vpop.f32.mrf.mxu0  ;;  %v628_v8 = vpop.f32.mrf.mxu1 }
  0xdb   : > { %v651_v9 = vpop.f32.mrf.mxu2  ;;  %v674_v10 = vpop.f32.mrf.mxu3  ;;  %2112 = vmatmul.msk.f32.gmra.mxu0 %vm210_vm0, %v605_v7  ;;  %2114 = vmatmul.msk.f32.gmra.mxu1 %vm210_vm0, %v628_v8 }
  0xdc   : > { %2116 = vmatmul.msk.f32.gmra.mxu2 %vm210_vm0, %v651_v9  ;;  %2118 = vmatmul.msk.f32.gmra.mxu3 %vm210_vm0, %v674_v10 }
  0xe0   : > { %v694_v11 = vpop.f32.mrf.mxu0  ;;  %v717_v12 = vpop.f32.mrf.mxu1 }
  0xe3   : > { %v740_v13 = vpop.f32.mrf.mxu2  ;;  %v763_v14 = vpop.f32.mrf.mxu3  ;;  %2119 = vmatmul.msk.f32.vlgmr.msrb.gmra.mxu0 %vm210_vm0, %v694_v11  ;;  %2121 = vmatmul.msk.f32.vlgmr.msrb.gmra.mxu1 %vm210_vm0, %v717_v12 }
  0xe4   : > { %2123 = vmatmul.msk.f32.vlgmr.msrb.gmra.mxu2 %vm210_vm0, %v740_v13  ;;  %2125 = vmatmul.msk.f32.vlgmr.msrb.gmra.mxu3 %vm210_vm0, %v763_v14 }
  0xe5   : > { %1845 = vmatpush.msrb.mxu2 %v2339_v34  ;;  %1874 = vmatpush.msrb.mxu3 %v2339_v34 }
  0xe6   : > { %1787 = vmatpush.msrb.mxu0 %v2339_v34  ;;  %1816 = vmatpush.msrb.mxu1 %v2339_v34 }
  0xe8   : > { %v697_v15 = vpop.f32.mrf.mxu0  ;;  %v720_v16 = vpop.f32.mrf.mxu1 }
  0xeb   : > { %v743_v17 = vpop.f32.mrf.mxu2  ;;  %v766_v18 = vpop.f32.mrf.mxu3  ;;  %2120 = vmatmul.msk.f32.gmra.mxu0 %vm210_vm0, %v697_v15  ;;  %2122 = vmatmul.msk.f32.gmra.mxu1 %vm210_vm0, %v720_v16 }
  0xec   : > { %2124 = vmatmul.msk.f32.gmra.mxu2 %vm210_vm0, %v743_v17  ;;  %2126 = vmatmul.msk.f32.gmra.mxu3 %vm210_vm0, %v766_v18 }
  0xf0   : > { %v786_v19 = vpop.f32.mrf.mxu0  ;;  %v809_v20 = vpop.f32.mrf.mxu1 }
  0xf3   : > { %v832_v21 = vpop.f32.mrf.mxu2  ;;  %v855_v22 = vpop.f32.mrf.mxu3  ;;  %2127 = vmatmul.msk.f32.vlgmr.msra.gmra.mxu0 %vm210_vm0, %v786_v19  ;;  %2129 = vmatmul.msk.f32.vlgmr.msra.gmra.mxu1 %vm210_vm0, %v809_v20 }
  0xf4   : > { %2131 = vmatmul.msk.f32.vlgmr.msra.gmra.mxu2 %vm210_vm0, %v832_v21  ;;  %2133 = vmatmul.msk.f32.vlgmr.msra.gmra.mxu3 %vm210_vm0, %v855_v22 }
  0xf8   : > { %v789_v23 = vpop.f32.mrf.mxu0  ;;  %v812_v24 = vpop.f32.mrf.mxu1 }
  0xfb   : > { %v835_v25 = vpop.f32.mrf.mxu2  ;;  %v858_v26 = vpop.f32.mrf.mxu3  ;;  %2128 = vmatmul.msk.f32.gmra.mxu0 %vm210_vm0, %v789_v23  ;;  %2130 = vmatmul.msk.f32.gmra.mxu1 %vm210_vm0, %v812_v24 }
  0xfc   : > { %2132 = vmatmul.msk.f32.gmra.mxu2 %vm210_vm0, %v835_v25  ;;  %2134 = vmatmul.msk.f32.gmra.mxu3 %vm210_vm0, %v858_v26 }
 0x100   : > { %v878_v27 = vpop.f32.mrf.mxu0  ;;  %v901_v28 = vpop.f32.mrf.mxu1 }
 0x103   : > { %v924_v29 = vpop.f32.mrf.mxu2  ;;  %v947_v30 = vpop.f32.mrf.mxu3  ;;  %2135 = vmatmul.msk.f32.vlgmr.msrb.gmra.mxu0 %vm210_vm0, %v878_v27  ;;  %2137 = vmatmul.msk.f32.vlgmr.msrb.gmra.mxu1 %vm210_vm0, %v901_v28 }
 0x104   : > { %2139 = vmatmul.msk.f32.vlgmr.msrb.gmra.mxu2 %vm210_vm0, %v924_v29  ;;  %2141 = vmatmul.msk.f32.vlgmr.msrb.gmra.mxu3 %vm210_vm0, %v947_v30 }
 0x108   : > { %v881_v31 = vpop.f32.mrf.mxu0  ;;  %v904_v32 = vpop.f32.mrf.mxu1 }
 0x10b   : > { %v927_v33 = vpop.f32.mrf.mxu2  ;;  %v950_v34 = vpop.f32.mrf.mxu3  ;;  %2136 = vmatmul.msk.f32.gmra.mxu0 %vm210_vm0, %v881_v31  ;;  %2138 = vmatmul.msk.f32.gmra.mxu1 %vm210_vm0, %v904_v32 }
 0x10c   : > { %2140 = vmatmul.msk.f32.gmra.mxu2 %vm210_vm0, %v927_v33  ;;  %2142 = vmatmul.msk.f32.gmra.mxu3 %vm210_vm0, %v950_v34 }
 0x110   : > { %v977_v35 = vpop.f32.mrf.mxu0  ;;  %v1006_v36 = vpop.f32.mrf.mxu1 }
 0x111   : > { %1883 = vst.msk [vmem:[%s2473_s28] sm:$0xff] %vm1882_vm1, %v977_v35 }
 0x112   : > { %1885 = vst.msk [vmem:[%s2473_s28 + $0x10] sm:$0xff] %vm1882_vm1, %v1006_v36 }
 0x117   : > { %v1035_v37 = vpop.f32.mrf.mxu2  ;;  %v1064_v38 = vpop.f32.mrf.mxu3 }
 0x118   : > { %1887 = vst.msk [vmem:[%s2473_s28 + $0x20] sm:$0xff] %vm1882_vm1, %v1035_v37  ;;  %v980_v39 = vpop.f32.mrf.mxu0  ;;  %v1009_v40 = vpop.f32.mrf.mxu1 }
 0x119   : > { %1889 = vst.msk [vmem:[%s2473_s28 + $0x30] sm:$0xff] %vm1882_vm1, %v1064_v38 }
 0x11a   : > { %1884 = vst.msk [vmem:[%s2473_s28 + $0x8] sm:$0xff] %vm1882_vm1, %v980_v39 }
 0x11b   : > { %1886 = vst.msk [vmem:[%s2473_s28 + $0x18] sm:$0xff] %vm1882_vm1, %v1009_v40 }
 0x11f   : > { %v1038_v41 = vpop.f32.mrf.mxu2  ;;  %v1067_v42 = vpop.f32.mrf.mxu3 }
 0x120   : > { %1888 = vst.msk [vmem:[%s2473_s28 + $0x28] sm:$0xff] %vm1882_vm1, %v1038_v41  ;;  %v1093_v43 = vpop.f32.mrf.mxu0  ;;  %v1122_v44 = vpop.f32.mrf.mxu1 }
 0x121   : > { %1890 = vst.msk [vmem:[%s2473_s28 + $0x38] sm:$0xff] %vm1882_vm1, %v1067_v42 }
 0x122   : > { %1891 = vst.msk [vmem:[%s2473_s28 + $0x40] sm:$0xff] %vm1882_vm1, %v1093_v43 }
 0x123   : > { %1893 = vst.msk [vmem:[%s2473_s28 + $0x50] sm:$0xff] %vm1882_vm1, %v1122_v44 }
 0x127   : > { %v1151_v45 = vpop.f32.mrf.mxu2  ;;  %v1180_v46 = vpop.f32.mrf.mxu3 }
 0x128   : > { %1895 = vst.msk [vmem:[%s2473_s28 + $0x60] sm:$0xff] %vm1882_vm1, %v1151_v45  ;;  %v1096_v47 = vpop.f32.mrf.mxu0  ;;  %v1125_v48 = vpop.f32.mrf.mxu1 }
 0x129   : > { %1897 = vst.msk [vmem:[%s2473_s28 + $0x70] sm:$0xff] %vm1882_vm1, %v1180_v46 }
 0x12a   : > { %1892 = vst.msk [vmem:[%s2473_s28 + $0x48] sm:$0xff] %vm1882_vm1, %v1096_v47 }
 0x12b   : > { %1894 = vst.msk [vmem:[%s2473_s28 + $0x58] sm:$0xff] %vm1882_vm1, %v1125_v48 }
 0x12f   : > { %v1154_v49 = vpop.f32.mrf.mxu2  ;;  %v1183_v50 = vpop.f32.mrf.mxu3 }
 0x130   : > { %1896 = vst.msk [vmem:[%s2473_s28 + $0x68] sm:$0xff] %vm1882_vm1, %v1154_v49  ;;  %v1209_v51 = vpop.f32.mrf.mxu0  ;;  %v1238_v52 = vpop.f32.mrf.mxu1 }
 0x131   : > { %1898 = vst.msk [vmem:[%s2473_s28 + $0x78] sm:$0xff] %vm1882_vm1, %v1183_v50 }
 0x132   : > { %1899 = vst.msk [vmem:[%s2473_s28 + $0x80] sm:$0xff] %vm1882_vm1, %v1209_v51 }
 0x133   : > { %1901 = vst.msk [vmem:[%s2473_s28 + $0x90] sm:$0xff] %vm1882_vm1, %v1238_v52 }
 0x137   : > { %v1267_v53 = vpop.f32.mrf.mxu2  ;;  %v1296_v54 = vpop.f32.mrf.mxu3 }
 0x138   : > { %1903 = vst.msk [vmem:[%s2473_s28 + $0xa0] sm:$0xff] %vm1882_vm1, %v1267_v53  ;;  %v1212_v55 = vpop.f32.mrf.mxu0  ;;  %v1241_v56 = vpop.f32.mrf.mxu1 }
 0x139   : > { %1905 = vst.msk [vmem:[%s2473_s28 + $0xb0] sm:$0xff] %vm1882_vm1, %v1296_v54 }
 0x13a   : > { %1900 = vst.msk [vmem:[%s2473_s28 + $0x88] sm:$0xff] %vm1882_vm1, %v1212_v55 }
 0x13b   : > { %1902 = vst.msk [vmem:[%s2473_s28 + $0x98] sm:$0xff] %vm1882_vm1, %v1241_v56 }
 0x13f   : > { %v1270_v57 = vpop.f32.mrf.mxu2  ;;  %v1299_v58 = vpop.f32.mrf.mxu3 }
 0x140   : > { %1904 = vst.msk [vmem:[%s2473_s28 + $0xa8] sm:$0xff] %vm1882_vm1, %v1270_v57  ;;  %v1325_v59 = vpop.f32.mrf.mxu0  ;;  %v1354_v60 = vpop.f32.mrf.mxu1 }
 0x141   : > { %1906 = vst.msk [vmem:[%s2473_s28 + $0xb8] sm:$0xff] %vm1882_vm1, %v1299_v58 }
 0x142   : > { %1907 = vst.msk [vmem:[%s2473_s28 + $0xc0] sm:$0xff] %vm1882_vm1, %v1325_v59 }
 0x143   : > { %1909 = vst.msk [vmem:[%s2473_s28 + $0xd0] sm:$0xff] %vm1882_vm1, %v1354_v60 }
 0x147   : > { %v1383_v61 = vpop.f32.mrf.mxu2  ;;  %v1412_v62 = vpop.f32.mrf.mxu3 }
 0x148   : > { %1911 = vst.msk [vmem:[%s2473_s28 + $0xe0] sm:$0xff] %vm1882_vm1, %v1383_v61  ;;  %v1328_v63 = vpop.f32.mrf.mxu0  ;;  %v1357_v0 = vpop.f32.mrf.mxu1 }
 0x149   : > { %1913 = vst.msk [vmem:[%s2473_s28 + $0xf0] sm:$0xff] %vm1882_vm1, %v1412_v62 }
 0x14a   : > { %1908 = vst.msk [vmem:[%s2473_s28 + $0xc8] sm:$0xff] %vm1882_vm1, %v1328_v63 }
 0x14b   : > { %1910 = vst.msk [vmem:[%s2473_s28 + $0xd8] sm:$0xff] %vm1882_vm1, %v1357_v0 }
 0x14f   : > { %v1386_v1 = vpop.f32.mrf.mxu2  ;;  %v1415_v2 = vpop.f32.mrf.mxu3 }
 0x150   : > { %1912 = vst.msk [vmem:[%s2473_s28 + $0xe8] sm:$0xff] %vm1882_vm1, %v1386_v1  ;;  %v1441_v3 = vpop.f32.mrf.mxu0  ;;  %v1470_v4 = vpop.f32.mrf.mxu1 }
 0x151   : > { %1914 = vst.msk [vmem:[%s2473_s28 + $0xf8] sm:$0xff] %vm1882_vm1, %v1415_v2 }
 0x152   : > { %1915 = vst.msk [vmem:[%s2473_s28 + $0x100] sm:$0xff] %vm1882_vm1, %v1441_v3 }
 0x153   : > { %1917 = vst.msk [vmem:[%s2473_s28 + $0x110] sm:$0xff] %vm1882_vm1, %v1470_v4 }
 0x157   : > { %v1499_v5 = vpop.f32.mrf.mxu2  ;;  %v1528_v6 = vpop.f32.mrf.mxu3 }
 0x158   : > { %1919 = vst.msk [vmem:[%s2473_s28 + $0x120] sm:$0xff] %vm1882_vm1, %v1499_v5  ;;  %v1444_v7 = vpop.f32.mrf.mxu0  ;;  %v1473_v8 = vpop.f32.mrf.mxu1 }
 0x159   : > { %1921 = vst.msk [vmem:[%s2473_s28 + $0x130] sm:$0xff] %vm1882_vm1, %v1528_v6 }
 0x15a   : > { %1916 = vst.msk [vmem:[%s2473_s28 + $0x108] sm:$0xff] %vm1882_vm1, %v1444_v7 }
 0x15b   : > { %1918 = vst.msk [vmem:[%s2473_s28 + $0x118] sm:$0xff] %vm1882_vm1, %v1473_v8 }
 0x15f   : > { %v1502_v9 = vpop.f32.mrf.mxu2  ;;  %v1531_v10 = vpop.f32.mrf.mxu3 }
 0x160   : > { %1920 = vst.msk [vmem:[%s2473_s28 + $0x128] sm:$0xff] %vm1882_vm1, %v1502_v9  ;;  %v1557_v11 = vpop.f32.mrf.mxu0  ;;  %v1586_v12 = vpop.f32.mrf.mxu1 }
 0x161   : > { %1922 = vst.msk [vmem:[%s2473_s28 + $0x138] sm:$0xff] %vm1882_vm1, %v1531_v10 }
 0x162   : > { %1923 = vst.msk [vmem:[%s2473_s28 + $0x140] sm:$0xff] %vm1882_vm1, %v1557_v11 }
 0x163   : > { %1925 = vst.msk [vmem:[%s2473_s28 + $0x150] sm:$0xff] %vm1882_vm1, %v1586_v12 }
 0x167   : > { %v1615_v13 = vpop.f32.mrf.mxu2  ;;  %v1644_v14 = vpop.f32.mrf.mxu3 }
 0x168   : > { %1927 = vst.msk [vmem:[%s2473_s28 + $0x160] sm:$0xff] %vm1882_vm1, %v1615_v13  ;;  %v1560_v15 = vpop.f32.mrf.mxu0  ;;  %v1589_v16 = vpop.f32.mrf.mxu1 }
 0x169   : > { %1929 = vst.msk [vmem:[%s2473_s28 + $0x170] sm:$0xff] %vm1882_vm1, %v1644_v14 }
 0x16a   : > { %1924 = vst.msk [vmem:[%s2473_s28 + $0x148] sm:$0xff] %vm1882_vm1, %v1560_v15 }
 0x16b   : > { %1926 = vst.msk [vmem:[%s2473_s28 + $0x158] sm:$0xff] %vm1882_vm1, %v1589_v16 }
 0x16f   : > { %v1618_v17 = vpop.f32.mrf.mxu2  ;;  %v1647_v18 = vpop.f32.mrf.mxu3 }
 0x170   : > { %1928 = vst.msk [vmem:[%s2473_s28 + $0x168] sm:$0xff] %vm1882_vm1, %v1618_v17  ;;  %v1673_v19 = vpop.f32.mrf.mxu0  ;;  %v1702_v20 = vpop.f32.mrf.mxu1 }
 0x171   : > { %1930 = vst.msk [vmem:[%s2473_s28 + $0x178] sm:$0xff] %vm1882_vm1, %v1647_v18 }
 0x172   : > { %1931 = vst.msk [vmem:[%s2473_s28 + $0x180] sm:$0xff] %vm1882_vm1, %v1673_v19 }
 0x173   : > { %1933 = vst.msk [vmem:[%s2473_s28 + $0x190] sm:$0xff] %vm1882_vm1, %v1702_v20 }
 0x177   : > { %v1731_v21 = vpop.f32.mrf.mxu2  ;;  %v1760_v22 = vpop.f32.mrf.mxu3 }
 0x178   : > { %1935 = vst.msk [vmem:[%s2473_s28 + $0x1a0] sm:$0xff] %vm1882_vm1, %v1731_v21  ;;  %v1676_v23 = vpop.f32.mrf.mxu0  ;;  %v1705_v24 = vpop.f32.mrf.mxu1 }
 0x179   : > { %1937 = vst.msk [vmem:[%s2473_s28 + $0x1b0] sm:$0xff] %vm1882_vm1, %v1760_v22 }
 0x17a   : > { %1932 = vst.msk [vmem:[%s2473_s28 + $0x188] sm:$0xff] %vm1882_vm1, %v1676_v23 }
 0x17b   : > { %1934 = vst.msk [vmem:[%s2473_s28 + $0x198] sm:$0xff] %vm1882_vm1, %v1705_v24 }
 0x17f   : > { %v1734_v25 = vpop.f32.mrf.mxu2  ;;  %v1763_v26 = vpop.f32.mrf.mxu3 }
 0x180   : > { %1936 = vst.msk [vmem:[%s2473_s28 + $0x1a8] sm:$0xff] %vm1882_vm1, %v1734_v25  ;;  %v1789_v27 = vpop.f32.mrf.mxu0  ;;  %v1818_v28 = vpop.f32.mrf.mxu1 }
 0x181   : > { %1938 = vst.msk [vmem:[%s2473_s28 + $0x1b8] sm:$0xff] %vm1882_vm1, %v1763_v26 }
 0x182   : > { %1939 = vst.msk [vmem:[%s2473_s28 + $0x1c0] sm:$0xff] %vm1882_vm1, %v1789_v27 }
 0x183   : > { %1941 = vst.msk [vmem:[%s2473_s28 + $0x1d0] sm:$0xff] %vm1882_vm1, %v1818_v28 }
 0x187   : > { %v1847_v29 = vpop.f32.mrf.mxu2  ;;  %v1876_v30 = vpop.f32.mrf.mxu3 }
 0x188   : > { %1943 = vst.msk [vmem:[%s2473_s28 + $0x1e0] sm:$0xff] %vm1882_vm1, %v1847_v29  ;;  %v1792_v31 = vpop.f32.mrf.mxu0  ;;  %v1821_v32 = vpop.f32.mrf.mxu1 }
 0x189   : > { %1945 = vst.msk [vmem:[%s2473_s28 + $0x1f0] sm:$0xff] %vm1882_vm1, %v1876_v30 }
 0x18a   : > { %1940 = vst.msk [vmem:[%s2473_s28 + $0x1c8] sm:$0xff] %vm1882_vm1, %v1792_v31 }
 0x18b   : > { %1942 = vst.msk [vmem:[%s2473_s28 + $0x1d8] sm:$0xff] %vm1882_vm1, %v1821_v32 }
 0x18f   : > { %v1850_v33 = vpop.f32.mrf.mxu2  ;;  %v1879_v34 = vpop.f32.mrf.mxu3 }
 0x190   : > { %1944 = vst.msk [vmem:[%s2473_s28 + $0x1e8] sm:$0xff] %vm1882_vm1, %v1850_v33 }
 0x191   : > { %1946 = vst.msk [vmem:[%s2473_s28 + $0x1f8] sm:$0xff] %vm1882_vm1, %v1879_v34 }
 0x192 PF: > { %s13_s12 = sadd.s32 1, %s2160_s12  }
 0x193   : > { %p10_p4 = scmp.ge.s32.totalorder %s13_s12, 4  }
 0x195   :  { %12 = sbr.rel (!%p10_p4) target bundleno = 1 (0x1), region = 62 }

</bundles_post_ra>
